<compile_context>
chip_gen: v7x
topology: tpu7x:2x2x1
jax: 0.10.0
libtpu: 0.0.40
codegen_flags: <defaults>
</compile_context>

<pallas_src>
import math
import functools

import jax
import jax.numpy as jnp
from jax.experimental import pallas as pl
from jax.experimental.pallas import tpu as pltpu

# small, module-consistent shapes
T = 8          # sequence length
B = 2          # batch
D_IN = 5       # dim_seq_in
D_META = 3     # dim_metadata
H = 32         # rnn_out
D_OUT = 16     # dim_out
G = 128        # lane tile width


def embed_atten_seq_kernel(
    seqs_ref,     # [T*bt, D_IN]   row index = t*bt + b (t-major within the tile)
    meta_ref,     # [bt, D_META]
    w_ih_ref,     # [D_IN, 2G]     r @ lanes [0,H), z @ [G/2,G/2+H), n @ [G,G+H)
    w_hh_ref,     # [G, 2G]        same column layout, rows >= H are zero
    b_ih_ref,     # [1, 2G]
    b_hh_ref,     # [1, 2G]
    w_qkv_ref,    # [G, 3G]        value|query|key, one 128-lane tile per gate
    b_qkv_ref,    # [1, 3G]
    w_oh_ref,     # [G, D_OUT]     rows >= H zero
    w_om_ref,     # [D_META, D_OUT]
    b_o_ref,      # [1, D_OUT]
    out_ref,      # [bt, D_OUT]
    *, t_len, hidden,
):
    two_g = w_hh_ref.shape[1]
    g = two_g // 2            # == G
    bt = out_ref.shape[0]

    # ---------------- GRU (num_layers=1, unidirectional, h0 = 0) -------------
    # Input projection for ALL timesteps in one matmul; only h @ W_hh is serial.
    gi_all = (jnp.dot(seqs_ref[...], w_ih_ref[...],
                      preferred_element_type=jnp.float32) + b_ih_ref[...])
    w_hh = w_hh_ref[...]
    b_hh = b_hh_ref[...]

    # Lane mask enforcing "padded hidden lanes are exactly 0" every step.
    hid_mask = jax.lax.broadcasted_iota(jnp.int32, (bt, g), 1) < hidden

    h = jnp.zeros((bt, g), jnp.float32)
    lat_steps = []
    # TODO(synk): confirm in the bundle dump that Mosaic hoists the identical
    # W_hh weight push out of this unrolled loop; if not, drive the MXU
    # explicitly (pltpu.matmul_push_rhs once + matmul_acc_lhs/matmul_pop here).
    for t in range(t_len):                     # T is static -> fully unrolled
        gi = gi_all[t * bt:(t + 1) * bt, :]                            # [bt, 2G]
        gh = jnp.dot(h, w_hh, preferred_element_type=jnp.float32) + b_hh
        s0 = gi[:, :g] + gh[:, :g]             # tile 0: r | z preactivations
        rz = jax.nn.sigmoid(s0)                # r @ [0,H), z @ [g/2, g/2+H)
        # n = tanh(i_n + r * h_n): r (tile 0, offset 0) meets h_n (tile 1,
        # offset 0) via a free 128-lane tile select -- no relayout needed.
        n_t = jnp.tanh(gi[:, g:] + rz * gh[:, g:])
        # Align z to the hidden lanes with a half-tile rotate (XLU slot,
        # direction-independent since g/2 == -g/2 mod g).
        z_al = pltpu.roll(rz, shift=g // 2, axis=1)
        h_new = (1.0 - z_al) * n_t + z_al * h
        h = jnp.where(hid_mask, h_new, 0.0)    # padded lanes pinned to 0
        lat_steps.append(h)

    # b-major stack keeps this flatten and the post-QKV reshape tile-aligned.
    lat_flat = jnp.stack(lat_steps, axis=1).reshape(bt * t_len, g)     # [bt*T, G]

    # ---------------- TransformerAttn (fused V/Q/K, batched) -----------------
    qkv = (jnp.dot(lat_flat, w_qkv_ref[...],
                   preferred_element_type=jnp.float32) + b_qkv_ref[...])
    qkv3 = qkv.reshape(bt, t_len, 3 * g)
    value = qkv3[:, :, 0:g]
    query = qkv3[:, :, g:2 * g]                # 1/sqrt(H) pre-folded into w_q/b_q
    keys = qkv3[:, :, 2 * g:3 * g]

    scores = jnp.einsum('btg,bsg->bts', value, query,
                        preferred_element_type=jnp.float32)            # [bt, T, T]
    wts = jax.nn.softmax(scores, axis=-1)
    attn = jnp.einsum('bts,bsg->btg', wts, keys,
                      preferred_element_type=jnp.float32)              # [bt, T, G]
    lat_sum = jnp.sum(attn, axis=1)                                    # [bt, G]

    # ---------------- out layer: Linear(H + D_META, D_OUT) + Tanh ------------
    pre = (jnp.dot(lat_sum, w_oh_ref[...], preferred_element_type=jnp.float32)
           + jnp.dot(meta_ref[...], w_om_ref[...], preferred_element_type=jnp.float32)
           + b_o_ref[...])
    # [bt, D_OUT] = [2, 16]: deliberately NOT padded to 128 lanes; output bytes
    # are negligible relative to weight/activation traffic.
    out_ref[...] = jnp.tanh(pre)


def make_params(key):
    ks = jax.random.split(key, 12)
    s = 0.1
    return {
        # GRU params (PyTorch layout: weight_ih_l0 [3H, D_IN], weight_hh_l0 [3H, H])
        "w_ih": s * jax.random.normal(ks[0], (3 * H, D_IN), jnp.float32),
        "w_hh": s * jax.random.normal(ks[1], (3 * H, H), jnp.float32),
        "b_ih": s * jax.random.normal(ks[2], (3 * H,), jnp.float32),
        "b_hh": s * jax.random.normal(ks[3], (3 * H,), jnp.float32),
        # TransformerAttn Linear layers ([out, in] like nn.Linear.weight)
        "w_v": s * jax.random.normal(ks[4], (H, H), jnp.float32),
        "b_v": s * jax.random.normal(ks[5], (H,), jnp.float32),
        "w_q": s * jax.random.normal(ks[6], (H, H), jnp.float32),
        "b_q": s * jax.random.normal(ks[7], (H,), jnp.float32),
        "w_k": s * jax.random.normal(ks[8], (H, H), jnp.float32),
        "b_k": s * jax.random.normal(ks[9], (H,), jnp.float32),
        # out_layer: Linear(H + D_META, D_OUT) then Tanh (Dropout(0.0) is a no-op)
        "w_out": s * jax.random.normal(ks[10], (D_OUT, H + D_META), jnp.float32),
        "b_out": s * jax.random.normal(ks[11], (D_OUT,), jnp.float32),
    }


def pack_params(p):
    """One-time packing of module weights into the kernel layout.

    Call ONCE at init and cache: per the perf review, none of these pads /
    transposes / concats should run on the per-step forward path.
    """
    half = G // 2
    inv_sqrt_h = 1.0 / math.sqrt(H)

    def pack_recurrent(w3):  # w3: [in, 3H], PyTorch gate order r|z|n along cols
        r, z, n = w3[:, :H], w3[:, H:2 * H], w3[:, 2 * H:3 * H]
        t0 = jnp.zeros((w3.shape[0], G), jnp.float32)
        t0 = t0.at[:, :H].set(r).at[:, half:half + H].set(z)
        t1 = jnp.zeros((w3.shape[0], G), jnp.float32).at[:, :H].set(n)
        return jnp.concatenate([t0, t1], axis=1)                       # [in, 2G]

    def gate_tile(w):        # nn.Linear weight [H, H] -> [H, G]
        return jnp.pad(w.T, ((0, 0), (0, G - H)))

    w_ih = pack_recurrent(p["w_ih"].T)                                  # [D_IN, 2G]
    w_hh = jnp.pad(pack_recurrent(p["w_hh"].T), ((0, G - H), (0, 0)))   # [G, 2G]
    b_ih = pack_recurrent(p["b_ih"].reshape(1, -1))                     # [1, 2G]
    b_hh = pack_recurrent(p["b_hh"].reshape(1, -1))                     # [1, 2G]

    # value|query|key, one 128-lane tile each; 1/sqrt(H) folded into query.
    w_qkv = jnp.concatenate([gate_tile(p["w_v"]),
                             gate_tile(p["w_q"] * inv_sqrt_h),
                             gate_tile(p["w_k"])], axis=1)              # [H, 3G]
    w_qkv = jnp.pad(w_qkv, ((0, G - H), (0, 0)))                        # [G, 3G]
    b_qkv = jnp.concatenate(
        [jnp.pad(p["b_v"].reshape(1, -1), ((0, 0), (0, G - H))),
         jnp.pad((p["b_q"] * inv_sqrt_h).reshape(1, -1), ((0, 0), (0, G - H))),
         jnp.pad(p["b_k"].reshape(1, -1), ((0, 0), (0, G - H)))],
        axis=1)                                                         # [1, 3G]

    w_oh = jnp.pad(p["w_out"][:, :H].T, ((0, G - H), (0, 0)))           # [G, D_OUT]
    w_om = p["w_out"][:, H:].T                                          # [D_META, D_OUT]
    b_o = p["b_out"].reshape(1, -1)                                     # [1, D_OUT]

    # TODO(synk): for large-batch production use, cast w_hh / w_qkv (and the
    # in-kernel activations) to bfloat16; kept f32 here so the 1e-4 reference
    # check stays tight.
    return dict(w_ih=w_ih, w_hh=w_hh, b_ih=b_ih, b_hh=b_hh,
                w_qkv=w_qkv, b_qkv=b_qkv, w_oh=w_oh, w_om=w_om, b_o=b_o)


@functools.partial(jax.jit, static_argnames=("batch_tile",))
def embed_atten_seq_pallas(seqs, metadata, packed, *, batch_tile=None):
    t_len, b_sz, d_in = seqs.shape
    d_meta = metadata.shape[1]
    d_out = packed["b_o"].shape[1]
    bt = b_sz if batch_tile is None else batch_tile
    assert b_sz % bt == 0, "batch must be divisible by batch_tile"
    n_tiles = b_sz // bt

    # Arrange seqs so each batch tile's rows are contiguous and t-major
    # (row = t*bt + b within a tile); reduces to a free reshape when n_tiles==1.
    seqs_tiled = (seqs.reshape(t_len, n_tiles, bt, d_in)
                      .transpose(1, 0, 2, 3)
                      .reshape(n_tiles * t_len * bt, d_in))

    weights = (packed["w_ih"], packed["w_hh"], packed["b_ih"], packed["b_hh"],
               packed["w_qkv"], packed["b_qkv"], packed["w_oh"], packed["w_om"],
               packed["b_o"])

    # Weights get constant index_maps: DMA'd once, VMEM-resident across grid
    # steps. Only seqs / metadata / out carry the (parallel) batch-tile axis.
    def const_spec(a):
        return pl.BlockSpec(a.shape, lambda i: (0, 0))

    in_specs = ([pl.BlockSpec((t_len * bt, d_in), lambda i: (i, 0)),
                 pl.BlockSpec((bt, d_meta), lambda i: (i, 0))]
                + [const_spec(a) for a in weights])
    out_spec = pl.BlockSpec((bt, d_out), lambda i: (i, 0))

    # Advisory cost estimate so XLA can overlap this small call with the
    # surrounding graph instead of treating it as an opaque blob.
    per_tile_flops = (
        2 * t_len * bt * d_in * 2 * G          # hoisted input projection
        + t_len * 2 * bt * G * 2 * G           # serial h @ W_hh chain
        + 2 * t_len * bt * G * 3 * G           # fused V/Q/K projection
        + 2 * 2 * bt * t_len * t_len * G       # attention scores + apply
        + 2 * bt * (G + d_meta) * d_out)       # output layer
    per_tile_transc = t_len * 2 * bt * G + bt * t_len * t_len + bt * d_out
    bytes_accessed = int(
        4 * (seqs.size + metadata.size + sum(w.size for w in weights)
             + b_sz * d_out))

    # TODO(synk): when batch tiles grow (bt >= 128 for real workloads), size
    # per-tile VMEM against v7x's 64 MiB physical / 32 MiB scoped default and
    # raise vmem_limit_bytes via pltpu.CompilerParams if needed.
    kernel = functools.partial(embed_atten_seq_kernel, t_len=t_len, hidden=H)
    return pl.pallas_call(
        kernel,
        out_shape=jax.ShapeDtypeStruct((b_sz, d_out), jnp.float32),
        grid=(n_tiles,),
        in_specs=in_specs,
        out_specs=out_spec,
        compiler_params=pltpu.CompilerParams(
            dimension_semantics=("parallel",)),
        cost_estimate=pl.CostEstimate(
            flops=int(per_tile_flops * n_tiles),
            transcendentals=int(per_tile_transc * n_tiles),
            bytes_accessed=bytes_accessed),
    )(seqs_tiled, metadata, *weights)


def embed_atten_seq_reference(seqs, metadata, p):
    # pure-JAX reference, mirrors the PyTorch forward exactly
    h = jnp.zeros((B, H), jnp.float32)
    lat = []
    for t in range(T):
        gi = seqs[t] @ p["w_ih"].T + p["b_ih"]
        gh = h @ p["w_hh"].T + p["b_hh"]
        i_r, i_z, i_n = gi[:, :H], gi[:, H:2 * H], gi[:, 2 * H:]
        h_r, h_z, h_n = gh[:, :H], gh[:, H:2 * H], gh[:, 2 * H:]
        r = jax.nn.sigmoid(i_r + h_r)
        z = jax.nn.sigmoid(i_z + h_z)
        n = jnp.tanh(i_n + r * h_n)
        h = (1.0 - z) * n + z * h
        lat.append(h)
    lat = jnp.stack(lat)                                  # [T, B, H]
    x = jnp.transpose(lat, (1, 0, 2))                     # [B, T, H]
    value = x @ p["w_v"].T + p["b_v"]
    query = x @ p["w_q"].T + p["b_q"]
    keys = x @ p["w_k"].T + p["b_k"]
    w = value @ jnp.swapaxes(query, 1, 2) / math.sqrt(H)
    w = jax.nn.softmax(w, axis=-1)
    attn = w @ keys                                       # [B, T, H]
    lat_sum = attn.sum(axis=1)                            # [B, H]
    cat = jnp.concatenate([lat_sum, metadata], axis=1)
    return jnp.tanh(cat @ p["w_out"].T + p["b_out"])


if __name__ == "__main__":
    key = jax.random.PRNGKey(0)
    k_seq, k_meta, k_par = jax.random.split(key, 3)
    seqs = jax.random.normal(k_seq, (T, B, D_IN), jnp.float32)
    metadata = jax.random.normal(k_meta, (B, D_META), jnp.float32)
    params = make_params(k_par)

    packed = pack_params(params)      # one-time, init-time weight packing

    out = embed_atten_seq_pallas(seqs, metadata, packed)
    out = jax.block_until_ready(out)

    ref = embed_atten_seq_reference(seqs, metadata, params)
    assert out.shape == (B, D_OUT)
    assert jnp.allclose(out, ref, atol=1e-4, rtol=1e-4), (out, ref)
    print("KERNEL_OK")
</pallas_src>

<mosaic_0001>
module attributes {stable_mosaic.version = 11 : i64} {
  func.func @embed_atten_seq_kernel(%arg0: i32, %arg1: memref<16x5xf32, #tpu.memory_space<vmem>>, %arg2: memref<2x3xf32, #tpu.memory_space<vmem>>, %arg3: memref<5x256xf32, #tpu.memory_space<vmem>>, %arg4: memref<128x256xf32, #tpu.memory_space<vmem>>, %arg5: memref<1x256xf32, #tpu.memory_space<vmem>>, %arg6: memref<1x256xf32, #tpu.memory_space<vmem>>, %arg7: memref<128x384xf32, #tpu.memory_space<vmem>>, %arg8: memref<1x384xf32, #tpu.memory_space<vmem>>, %arg9: memref<128x16xf32, #tpu.memory_space<vmem>>, %arg10: memref<3x16xf32, #tpu.memory_space<vmem>>, %arg11: memref<1x16xf32, #tpu.memory_space<vmem>>, %arg12: memref<2x16xf32, #tpu.memory_space<vmem>>) attributes {dimension_semantics = [#tpu.dimension_semantics<parallel>], iteration_bounds = array<i64: 1>, scalar_prefetch = 0 : i64, scratch_operands = 0 : i64, tpu.core_type = #tpu.core_type<tc>, window_params = [{transform_indices = @transform_0, window_bounds = array<i64: 16, 5>}, {transform_indices = @transform_1, window_bounds = array<i64: 2, 3>}, {pipeline_mode = #tpu.pipeline_mode<synchronous>, transform_indices = @transform_2, window_bounds = array<i64: 5, 256>}, {pipeline_mode = #tpu.pipeline_mode<synchronous>, transform_indices = @transform_3, window_bounds = array<i64: 128, 256>}, {pipeline_mode = #tpu.pipeline_mode<synchronous>, transform_indices = @transform_4, window_bounds = array<i64: 1, 256>}, {pipeline_mode = #tpu.pipeline_mode<synchronous>, transform_indices = @transform_5, window_bounds = array<i64: 1, 256>}, {pipeline_mode = #tpu.pipeline_mode<synchronous>, transform_indices = @transform_6, window_bounds = array<i64: 128, 384>}, {pipeline_mode = #tpu.pipeline_mode<synchronous>, transform_indices = @transform_7, window_bounds = array<i64: 1, 384>}, {pipeline_mode = #tpu.pipeline_mode<synchronous>, transform_indices = @transform_8, window_bounds = array<i64: 128, 16>}, {pipeline_mode = #tpu.pipeline_mode<synchronous>, transform_indices = @transform_9, window_bounds = array<i64: 3, 16>}, {pipeline_mode = #tpu.pipeline_mode<synchronous>, transform_indices = @transform_10, window_bounds = array<i64: 1, 16>}, {transform_indices = @transform_11, window_bounds = array<i64: 2, 16>}]} {
    %c0 = arith.constant 0 : index
    %c0_0 = arith.constant 0 : index
    %0 = vector.load %arg1[%c0, %c0_0] : memref<16x5xf32, #tpu.memory_space<vmem>>, vector<16x5xf32>
    %c0_1 = arith.constant 0 : index
    %c0_2 = arith.constant 0 : index
    %1 = vector.load %arg3[%c0_1, %c0_2] : memref<5x256xf32, #tpu.memory_space<vmem>>, vector<5x256xf32>
    %cst = arith.constant dense<0.000000e+00> : vector<16x256xf32>
    %2 = tpu.matmul %0, %1, %cst {dimension_numbers = #tpu.dot_dimension_numbers<[1], [0], [0], [1], [0, 0, 1, 1], [], []>} : vector<16x5xf32>, vector<5x256xf32>, vector<16x256xf32> -> vector<16x256xf32>
    %c0_3 = arith.constant 0 : index
    %c0_4 = arith.constant 0 : index
    %3 = vector.load %arg5[%c0_3, %c0_4] : memref<1x256xf32, #tpu.memory_space<vmem>>, vector<1x256xf32>
    %4 = vector.broadcast %3 : vector<1x256xf32> to vector<16x256xf32>
    %5 = arith.addf %2, %4 : vector<16x256xf32>
    %c0_5 = arith.constant 0 : index
    %c0_6 = arith.constant 0 : index
    %6 = vector.load %arg4[%c0_5, %c0_6] : memref<128x256xf32, #tpu.memory_space<vmem>>, vector<128x256xf32>
    %c0_7 = arith.constant 0 : index
    %c0_8 = arith.constant 0 : index
    %7 = vector.load %arg6[%c0_7, %c0_8] : memref<1x256xf32, #tpu.memory_space<vmem>>, vector<1x256xf32>
    %8 = tpu.iota {dimensions = array<i32: 1>} : vector<2x128xi32>
    %c32_i32 = arith.constant 32 : i32
    %9 = vector.broadcast %c32_i32 : i32 to vector<2x128xi32>
    %10 = arith.cmpi slt, %8, %9 : vector<2x128xi32>
    %cst_9 = arith.constant 0.000000e+00 : f32
    %11 = vector.broadcast %cst_9 : f32 to vector<2x128xf32>
    %12 = vector.extract_strided_slice %5 {offsets = [0, 0], sizes = [2, 256], strides = [1, 1]} : vector<16x256xf32> to vector<2x256xf32>
    %cst_10 = arith.constant dense<0.000000e+00> : vector<2x256xf32>
    %13 = tpu.matmul %11, %6, %cst_10 {dimension_numbers = #tpu.dot_dimension_numbers<[1], [0], [0], [1], [0, 0, 1, 1], [], []>} : vector<2x128xf32>, vector<128x256xf32>, vector<2x256xf32> -> vector<2x256xf32>
    %14 = vector.broadcast %7 : vector<1x256xf32> to vector<2x256xf32>
    %15 = arith.addf %13, %14 : vector<2x256xf32>
    %16 = vector.extract_strided_slice %12 {offsets = [0, 0], sizes = [2, 128], strides = [1, 1]} : vector<2x256xf32> to vector<2x128xf32>
    %17 = vector.extract_strided_slice %15 {offsets = [0, 0], sizes = [2, 128], strides = [1, 1]} : vector<2x256xf32> to vector<2x128xf32>
    %18 = arith.addf %16, %17 : vector<2x128xf32>
    %19 = arith.negf %18 : vector<2x128xf32>
    %20 = math.exp %19 : vector<2x128xf32>
    %cst_11 = arith.constant 1.000000e+00 : f32
    %21 = vector.broadcast %cst_11 : f32 to vector<2x128xf32>
    %22 = arith.addf %21, %20 : vector<2x128xf32>
    %23 = arith.divf %21, %22 : vector<2x128xf32>
    %24 = vector.extract_strided_slice %12 {offsets = [0, 128], sizes = [2, 128], strides = [1, 1]} : vector<2x256xf32> to vector<2x128xf32>
    %25 = vector.extract_strided_slice %15 {offsets = [0, 128], sizes = [2, 128], strides = [1, 1]} : vector<2x256xf32> to vector<2x128xf32>
    %26 = arith.mulf %23, %25 : vector<2x128xf32>
    %27 = arith.addf %24, %26 : vector<2x128xf32>
    %28 = math.tanh %27 : vector<2x128xf32>
    %c64_i32 = arith.constant 64 : i32
    %29 = tpu.dynamic_rotate %23 by %c64_i32 dim 1 : vector<2x128xf32>, i32 -> vector<2x128xf32>
    %cst_12 = arith.constant 1.000000e+00 : f32
    %30 = vector.broadcast %cst_12 : f32 to vector<2x128xf32>
    %31 = arith.subf %30, %29 : vector<2x128xf32>
    %32 = arith.mulf %31, %28 : vector<2x128xf32>
    %33 = arith.mulf %29, %11 : vector<2x128xf32>
    %34 = arith.addf %32, %33 : vector<2x128xf32>
    %cst_13 = arith.constant 0.000000e+00 : f32
    %35 = vector.broadcast %cst_13 : f32 to vector<2x128xf32>
    %36 = arith.select %10, %34, %35 : vector<2x128xi1>, vector<2x128xf32>
    %37 = vector.extract_strided_slice %5 {offsets = [2, 0], sizes = [2, 256], strides = [1, 1]} : vector<16x256xf32> to vector<2x256xf32>
    %cst_14 = arith.constant dense<0.000000e+00> : vector<2x256xf32>
    %38 = tpu.matmul %36, %6, %cst_14 {dimension_numbers = #tpu.dot_dimension_numbers<[1], [0], [0], [1], [0, 0, 1, 1], [], []>} : vector<2x128xf32>, vector<128x256xf32>, vector<2x256xf32> -> vector<2x256xf32>
    %39 = vector.broadcast %7 : vector<1x256xf32> to vector<2x256xf32>
    %40 = arith.addf %38, %39 : vector<2x256xf32>
    %41 = vector.extract_strided_slice %37 {offsets = [0, 0], sizes = [2, 128], strides = [1, 1]} : vector<2x256xf32> to vector<2x128xf32>
    %42 = vector.extract_strided_slice %40 {offsets = [0, 0], sizes = [2, 128], strides = [1, 1]} : vector<2x256xf32> to vector<2x128xf32>
    %43 = arith.addf %41, %42 : vector<2x128xf32>
    %44 = arith.negf %43 : vector<2x128xf32>
    %45 = math.exp %44 : vector<2x128xf32>
    %cst_15 = arith.constant 1.000000e+00 : f32
    %46 = vector.broadcast %cst_15 : f32 to vector<2x128xf32>
    %47 = arith.addf %46, %45 : vector<2x128xf32>
    %48 = arith.divf %46, %47 : vector<2x128xf32>
    %49 = vector.extract_strided_slice %37 {offsets = [0, 128], sizes = [2, 128], strides = [1, 1]} : vector<2x256xf32> to vector<2x128xf32>
    %50 = vector.extract_strided_slice %40 {offsets = [0, 128], sizes = [2, 128], strides = [1, 1]} : vector<2x256xf32> to vector<2x128xf32>
    %51 = arith.mulf %48, %50 : vector<2x128xf32>
    %52 = arith.addf %49, %51 : vector<2x128xf32>
    %53 = math.tanh %52 : vector<2x128xf32>
    %c64_i32_16 = arith.constant 64 : i32
    %54 = tpu.dynamic_rotate %48 by %c64_i32_16 dim 1 : vector<2x128xf32>, i32 -> vector<2x128xf32>
    %cst_17 = arith.constant 1.000000e+00 : f32
    %55 = vector.broadcast %cst_17 : f32 to vector<2x128xf32>
    %56 = arith.subf %55, %54 : vector<2x128xf32>
    %57 = arith.mulf %56, %53 : vector<2x128xf32>
    %58 = arith.mulf %54, %36 : vector<2x128xf32>
    %59 = arith.addf %57, %58 : vector<2x128xf32>
    %cst_18 = arith.constant 0.000000e+00 : f32
    %60 = vector.broadcast %cst_18 : f32 to vector<2x128xf32>
    %61 = arith.select %10, %59, %60 : vector<2x128xi1>, vector<2x128xf32>
    %62 = vector.extract_strided_slice %5 {offsets = [4, 0], sizes = [2, 256], strides = [1, 1]} : vector<16x256xf32> to vector<2x256xf32>
    %cst_19 = arith.constant dense<0.000000e+00> : vector<2x256xf32>
    %63 = tpu.matmul %61, %6, %cst_19 {dimension_numbers = #tpu.dot_dimension_numbers<[1], [0], [0], [1], [0, 0, 1, 1], [], []>} : vector<2x128xf32>, vector<128x256xf32>, vector<2x256xf32> -> vector<2x256xf32>
    %64 = vector.broadcast %7 : vector<1x256xf32> to vector<2x256xf32>
    %65 = arith.addf %63, %64 : vector<2x256xf32>
    %66 = vector.extract_strided_slice %62 {offsets = [0, 0], sizes = [2, 128], strides = [1, 1]} : vector<2x256xf32> to vector<2x128xf32>
    %67 = vector.extract_strided_slice %65 {offsets = [0, 0], sizes = [2, 128], strides = [1, 1]} : vector<2x256xf32> to vector<2x128xf32>
    %68 = arith.addf %66, %67 : vector<2x128xf32>
    %69 = arith.negf %68 : vector<2x128xf32>
    %70 = math.exp %69 : vector<2x128xf32>
    %cst_20 = arith.constant 1.000000e+00 : f32
    %71 = vector.broadcast %cst_20 : f32 to vector<2x128xf32>
    %72 = arith.addf %71, %70 : vector<2x128xf32>
    %73 = arith.divf %71, %72 : vector<2x128xf32>
    %74 = vector.extract_strided_slice %62 {offsets = [0, 128], sizes = [2, 128], strides = [1, 1]} : vector<2x256xf32> to vector<2x128xf32>
    %75 = vector.extract_strided_slice %65 {offsets = [0, 128], sizes = [2, 128], strides = [1, 1]} : vector<2x256xf32> to vector<2x128xf32>
    %76 = arith.mulf %73, %75 : vector<2x128xf32>
    %77 = arith.addf %74, %76 : vector<2x128xf32>
    %78 = math.tanh %77 : vector<2x128xf32>
    %c64_i32_21 = arith.constant 64 : i32
    %79 = tpu.dynamic_rotate %73 by %c64_i32_21 dim 1 : vector<2x128xf32>, i32 -> vector<2x128xf32>
    %cst_22 = arith.constant 1.000000e+00 : f32
    %80 = vector.broadcast %cst_22 : f32 to vector<2x128xf32>
    %81 = arith.subf %80, %79 : vector<2x128xf32>
    %82 = arith.mulf %81, %78 : vector<2x128xf32>
    %83 = arith.mulf %79, %61 : vector<2x128xf32>
    %84 = arith.addf %82, %83 : vector<2x128xf32>
    %cst_23 = arith.constant 0.000000e+00 : f32
    %85 = vector.broadcast %cst_23 : f32 to vector<2x128xf32>
    %86 = arith.select %10, %84, %85 : vector<2x128xi1>, vector<2x128xf32>
    %87 = vector.extract_strided_slice %5 {offsets = [6, 0], sizes = [2, 256], strides = [1, 1]} : vector<16x256xf32> to vector<2x256xf32>
    %cst_24 = arith.constant dense<0.000000e+00> : vector<2x256xf32>
    %88 = tpu.matmul %86, %6, %cst_24 {dimension_numbers = #tpu.dot_dimension_numbers<[1], [0], [0], [1], [0, 0, 1, 1], [], []>} : vector<2x128xf32>, vector<128x256xf32>, vector<2x256xf32> -> vector<2x256xf32>
    %89 = vector.broadcast %7 : vector<1x256xf32> to vector<2x256xf32>
    %90 = arith.addf %88, %89 : vector<2x256xf32>
    %91 = vector.extract_strided_slice %87 {offsets = [0, 0], sizes = [2, 128], strides = [1, 1]} : vector<2x256xf32> to vector<2x128xf32>
    %92 = vector.extract_strided_slice %90 {offsets = [0, 0], sizes = [2, 128], strides = [1, 1]} : vector<2x256xf32> to vector<2x128xf32>
    %93 = arith.addf %91, %92 : vector<2x128xf32>
    %94 = arith.negf %93 : vector<2x128xf32>
    %95 = math.exp %94 : vector<2x128xf32>
    %cst_25 = arith.constant 1.000000e+00 : f32
    %96 = vector.broadcast %cst_25 : f32 to vector<2x128xf32>
    %97 = arith.addf %96, %95 : vector<2x128xf32>
    %98 = arith.divf %96, %97 : vector<2x128xf32>
    %99 = vector.extract_strided_slice %87 {offsets = [0, 128], sizes = [2, 128], strides = [1, 1]} : vector<2x256xf32> to vector<2x128xf32>
    %100 = vector.extract_strided_slice %90 {offsets = [0, 128], sizes = [2, 128], strides = [1, 1]} : vector<2x256xf32> to vector<2x128xf32>
    %101 = arith.mulf %98, %100 : vector<2x128xf32>
    %102 = arith.addf %99, %101 : vector<2x128xf32>
    %103 = math.tanh %102 : vector<2x128xf32>
    %c64_i32_26 = arith.constant 64 : i32
    %104 = tpu.dynamic_rotate %98 by %c64_i32_26 dim 1 : vector<2x128xf32>, i32 -> vector<2x128xf32>
    %cst_27 = arith.constant 1.000000e+00 : f32
    %105 = vector.broadcast %cst_27 : f32 to vector<2x128xf32>
    %106 = arith.subf %105, %104 : vector<2x128xf32>
    %107 = arith.mulf %106, %103 : vector<2x128xf32>
    %108 = arith.mulf %104, %86 : vector<2x128xf32>
    %109 = arith.addf %107, %108 : vector<2x128xf32>
    %cst_28 = arith.constant 0.000000e+00 : f32
    %110 = vector.broadcast %cst_28 : f32 to vector<2x128xf32>
    %111 = arith.select %10, %109, %110 : vector<2x128xi1>, vector<2x128xf32>
    %112 = vector.extract_strided_slice %5 {offsets = [8, 0], sizes = [2, 256], strides = [1, 1]} : vector<16x256xf32> to vector<2x256xf32>
    %cst_29 = arith.constant dense<0.000000e+00> : vector<2x256xf32>
    %113 = tpu.matmul %111, %6, %cst_29 {dimension_numbers = #tpu.dot_dimension_numbers<[1], [0], [0], [1], [0, 0, 1, 1], [], []>} : vector<2x128xf32>, vector<128x256xf32>, vector<2x256xf32> -> vector<2x256xf32>
    %114 = vector.broadcast %7 : vector<1x256xf32> to vector<2x256xf32>
    %115 = arith.addf %113, %114 : vector<2x256xf32>
    %116 = vector.extract_strided_slice %112 {offsets = [0, 0], sizes = [2, 128], strides = [1, 1]} : vector<2x256xf32> to vector<2x128xf32>
    %117 = vector.extract_strided_slice %115 {offsets = [0, 0], sizes = [2, 128], strides = [1, 1]} : vector<2x256xf32> to vector<2x128xf32>
    %118 = arith.addf %116, %117 : vector<2x128xf32>
    %119 = arith.negf %118 : vector<2x128xf32>
    %120 = math.exp %119 : vector<2x128xf32>
    %cst_30 = arith.constant 1.000000e+00 : f32
    %121 = vector.broadcast %cst_30 : f32 to vector<2x128xf32>
    %122 = arith.addf %121, %120 : vector<2x128xf32>
    %123 = arith.divf %121, %122 : vector<2x128xf32>
    %124 = vector.extract_strided_slice %112 {offsets = [0, 128], sizes = [2, 128], strides = [1, 1]} : vector<2x256xf32> to vector<2x128xf32>
    %125 = vector.extract_strided_slice %115 {offsets = [0, 128], sizes = [2, 128], strides = [1, 1]} : vector<2x256xf32> to vector<2x128xf32>
    %126 = arith.mulf %123, %125 : vector<2x128xf32>
    %127 = arith.addf %124, %126 : vector<2x128xf32>
    %128 = math.tanh %127 : vector<2x128xf32>
    %c64_i32_31 = arith.constant 64 : i32
    %129 = tpu.dynamic_rotate %123 by %c64_i32_31 dim 1 : vector<2x128xf32>, i32 -> vector<2x128xf32>
    %cst_32 = arith.constant 1.000000e+00 : f32
    %130 = vector.broadcast %cst_32 : f32 to vector<2x128xf32>
    %131 = arith.subf %130, %129 : vector<2x128xf32>
    %132 = arith.mulf %131, %128 : vector<2x128xf32>
    %133 = arith.mulf %129, %111 : vector<2x128xf32>
    %134 = arith.addf %132, %133 : vector<2x128xf32>
    %cst_33 = arith.constant 0.000000e+00 : f32
    %135 = vector.broadcast %cst_33 : f32 to vector<2x128xf32>
    %136 = arith.select %10, %134, %135 : vector<2x128xi1>, vector<2x128xf32>
    %137 = vector.extract_strided_slice %5 {offsets = [10, 0], sizes = [2, 256], strides = [1, 1]} : vector<16x256xf32> to vector<2x256xf32>
    %cst_34 = arith.constant dense<0.000000e+00> : vector<2x256xf32>
    %138 = tpu.matmul %136, %6, %cst_34 {dimension_numbers = #tpu.dot_dimension_numbers<[1], [0], [0], [1], [0, 0, 1, 1], [], []>} : vector<2x128xf32>, vector<128x256xf32>, vector<2x256xf32> -> vector<2x256xf32>
    %139 = vector.broadcast %7 : vector<1x256xf32> to vector<2x256xf32>
    %140 = arith.addf %138, %139 : vector<2x256xf32>
    %141 = vector.extract_strided_slice %137 {offsets = [0, 0], sizes = [2, 128], strides = [1, 1]} : vector<2x256xf32> to vector<2x128xf32>
    %142 = vector.extract_strided_slice %140 {offsets = [0, 0], sizes = [2, 128], strides = [1, 1]} : vector<2x256xf32> to vector<2x128xf32>
    %143 = arith.addf %141, %142 : vector<2x128xf32>
    %144 = arith.negf %143 : vector<2x128xf32>
    %145 = math.exp %144 : vector<2x128xf32>
    %cst_35 = arith.constant 1.000000e+00 : f32
    %146 = vector.broadcast %cst_35 : f32 to vector<2x128xf32>
    %147 = arith.addf %146, %145 : vector<2x128xf32>
    %148 = arith.divf %146, %147 : vector<2x128xf32>
    %149 = vector.extract_strided_slice %137 {offsets = [0, 128], sizes = [2, 128], strides = [1, 1]} : vector<2x256xf32> to vector<2x128xf32>
    %150 = vector.extract_strided_slice %140 {offsets = [0, 128], sizes = [2, 128], strides = [1, 1]} : vector<2x256xf32> to vector<2x128xf32>
    %151 = arith.mulf %148, %150 : vector<2x128xf32>
    %152 = arith.addf %149, %151 : vector<2x128xf32>
    %153 = math.tanh %152 : vector<2x128xf32>
    %c64_i32_36 = arith.constant 64 : i32
    %154 = tpu.dynamic_rotate %148 by %c64_i32_36 dim 1 : vector<2x128xf32>, i32 -> vector<2x128xf32>
    %cst_37 = arith.constant 1.000000e+00 : f32
    %155 = vector.broadcast %cst_37 : f32 to vector<2x128xf32>
    %156 = arith.subf %155, %154 : vector<2x128xf32>
    %157 = arith.mulf %156, %153 : vector<2x128xf32>
    %158 = arith.mulf %154, %136 : vector<2x128xf32>
    %159 = arith.addf %157, %158 : vector<2x128xf32>
    %cst_38 = arith.constant 0.000000e+00 : f32
    %160 = vector.broadcast %cst_38 : f32 to vector<2x128xf32>
    %161 = arith.select %10, %159, %160 : vector<2x128xi1>, vector<2x128xf32>
    %162 = vector.extract_strided_slice %5 {offsets = [12, 0], sizes = [2, 256], strides = [1, 1]} : vector<16x256xf32> to vector<2x256xf32>
    %cst_39 = arith.constant dense<0.000000e+00> : vector<2x256xf32>
    %163 = tpu.matmul %161, %6, %cst_39 {dimension_numbers = #tpu.dot_dimension_numbers<[1], [0], [0], [1], [0, 0, 1, 1], [], []>} : vector<2x128xf32>, vector<128x256xf32>, vector<2x256xf32> -> vector<2x256xf32>
    %164 = vector.broadcast %7 : vector<1x256xf32> to vector<2x256xf32>
    %165 = arith.addf %163, %164 : vector<2x256xf32>
    %166 = vector.extract_strided_slice %162 {offsets = [0, 0], sizes = [2, 128], strides = [1, 1]} : vector<2x256xf32> to vector<2x128xf32>
    %167 = vector.extract_strided_slice %165 {offsets = [0, 0], sizes = [2, 128], strides = [1, 1]} : vector<2x256xf32> to vector<2x128xf32>
    %168 = arith.addf %166, %167 : vector<2x128xf32>
    %169 = arith.negf %168 : vector<2x128xf32>
    %170 = math.exp %169 : vector<2x128xf32>
    %cst_40 = arith.constant 1.000000e+00 : f32
    %171 = vector.broadcast %cst_40 : f32 to vector<2x128xf32>
    %172 = arith.addf %171, %170 : vector<2x128xf32>
    %173 = arith.divf %171, %172 : vector<2x128xf32>
    %174 = vector.extract_strided_slice %162 {offsets = [0, 128], sizes = [2, 128], strides = [1, 1]} : vector<2x256xf32> to vector<2x128xf32>
    %175 = vector.extract_strided_slice %165 {offsets = [0, 128], sizes = [2, 128], strides = [1, 1]} : vector<2x256xf32> to vector<2x128xf32>
    %176 = arith.mulf %173, %175 : vector<2x128xf32>
    %177 = arith.addf %174, %176 : vector<2x128xf32>
    %178 = math.tanh %177 : vector<2x128xf32>
    %c64_i32_41 = arith.constant 64 : i32
    %179 = tpu.dynamic_rotate %173 by %c64_i32_41 dim 1 : vector<2x128xf32>, i32 -> vector<2x128xf32>
    %cst_42 = arith.constant 1.000000e+00 : f32
    %180 = vector.broadcast %cst_42 : f32 to vector<2x128xf32>
    %181 = arith.subf %180, %179 : vector<2x128xf32>
    %182 = arith.mulf %181, %178 : vector<2x128xf32>
    %183 = arith.mulf %179, %161 : vector<2x128xf32>
    %184 = arith.addf %182, %183 : vector<2x128xf32>
    %cst_43 = arith.constant 0.000000e+00 : f32
    %185 = vector.broadcast %cst_43 : f32 to vector<2x128xf32>
    %186 = arith.select %10, %184, %185 : vector<2x128xi1>, vector<2x128xf32>
    %187 = vector.extract_strided_slice %5 {offsets = [14, 0], sizes = [2, 256], strides = [1, 1]} : vector<16x256xf32> to vector<2x256xf32>
    %cst_44 = arith.constant dense<0.000000e+00> : vector<2x256xf32>
    %188 = tpu.matmul %186, %6, %cst_44 {dimension_numbers = #tpu.dot_dimension_numbers<[1], [0], [0], [1], [0, 0, 1, 1], [], []>} : vector<2x128xf32>, vector<128x256xf32>, vector<2x256xf32> -> vector<2x256xf32>
    %189 = vector.broadcast %7 : vector<1x256xf32> to vector<2x256xf32>
    %190 = arith.addf %188, %189 : vector<2x256xf32>
    %191 = vector.extract_strided_slice %187 {offsets = [0, 0], sizes = [2, 128], strides = [1, 1]} : vector<2x256xf32> to vector<2x128xf32>
    %192 = vector.extract_strided_slice %190 {offsets = [0, 0], sizes = [2, 128], strides = [1, 1]} : vector<2x256xf32> to vector<2x128xf32>
    %193 = arith.addf %191, %192 : vector<2x128xf32>
    %194 = arith.negf %193 : vector<2x128xf32>
    %195 = math.exp %194 : vector<2x128xf32>
    %cst_45 = arith.constant 1.000000e+00 : f32
    %196 = vector.broadcast %cst_45 : f32 to vector<2x128xf32>
    %197 = arith.addf %196, %195 : vector<2x128xf32>
    %198 = arith.divf %196, %197 : vector<2x128xf32>
    %199 = vector.extract_strided_slice %187 {offsets = [0, 128], sizes = [2, 128], strides = [1, 1]} : vector<2x256xf32> to vector<2x128xf32>
    %200 = vector.extract_strided_slice %190 {offsets = [0, 128], sizes = [2, 128], strides = [1, 1]} : vector<2x256xf32> to vector<2x128xf32>
    %201 = arith.mulf %198, %200 : vector<2x128xf32>
    %202 = arith.addf %199, %201 : vector<2x128xf32>
    %203 = math.tanh %202 : vector<2x128xf32>
    %c64_i32_46 = arith.constant 64 : i32
    %204 = tpu.dynamic_rotate %198 by %c64_i32_46 dim 1 : vector<2x128xf32>, i32 -> vector<2x128xf32>
    %cst_47 = arith.constant 1.000000e+00 : f32
    %205 = vector.broadcast %cst_47 : f32 to vector<2x128xf32>
    %206 = arith.subf %205, %204 : vector<2x128xf32>
    %207 = arith.mulf %206, %203 : vector<2x128xf32>
    %208 = arith.mulf %204, %186 : vector<2x128xf32>
    %209 = arith.addf %207, %208 : vector<2x128xf32>
    %cst_48 = arith.constant 0.000000e+00 : f32
    %210 = vector.broadcast %cst_48 : f32 to vector<2x128xf32>
    %211 = arith.select %10, %209, %210 : vector<2x128xi1>, vector<2x128xf32>
    %212 = vector.shape_cast %36 : vector<2x128xf32> to vector<2x1x128xf32>
    %213 = vector.shape_cast %61 : vector<2x128xf32> to vector<2x1x128xf32>
    %214 = vector.shape_cast %86 : vector<2x128xf32> to vector<2x1x128xf32>
    %215 = vector.shape_cast %111 : vector<2x128xf32> to vector<2x1x128xf32>
    %216 = vector.shape_cast %136 : vector<2x128xf32> to vector<2x1x128xf32>
    %217 = vector.shape_cast %161 : vector<2x128xf32> to vector<2x1x128xf32>
    %218 = vector.shape_cast %186 : vector<2x128xf32> to vector<2x1x128xf32>
    %219 = vector.shape_cast %211 : vector<2x128xf32> to vector<2x1x128xf32>
    %220 = tpu.concatenate %212, %213, %214, %215, %216, %217, %218, %219 in 1 : vector<2x1x128xf32>, vector<2x1x128xf32>, vector<2x1x128xf32>, vector<2x1x128xf32>, vector<2x1x128xf32>, vector<2x1x128xf32>, vector<2x1x128xf32>, vector<2x1x128xf32> -> vector<2x8x128xf32>
    %221 = vector.shape_cast %220 : vector<2x8x128xf32> to vector<16x128xf32>
    %c0_49 = arith.constant 0 : index
    %c0_50 = arith.constant 0 : index
    %222 = vector.load %arg7[%c0_49, %c0_50] : memref<128x384xf32, #tpu.memory_space<vmem>>, vector<128x384xf32>
    %cst_51 = arith.constant dense<0.000000e+00> : vector<16x384xf32>
    %223 = tpu.matmul %221, %222, %cst_51 {dimension_numbers = #tpu.dot_dimension_numbers<[1], [0], [0], [1], [0, 0, 1, 1], [], []>} : vector<16x128xf32>, vector<128x384xf32>, vector<16x384xf32> -> vector<16x384xf32>
    %c0_52 = arith.constant 0 : index
    %c0_53 = arith.constant 0 : index
    %224 = vector.load %arg8[%c0_52, %c0_53] : memref<1x384xf32, #tpu.memory_space<vmem>>, vector<1x384xf32>
    %225 = vector.broadcast %224 : vector<1x384xf32> to vector<16x384xf32>
    %226 = arith.addf %223, %225 : vector<16x384xf32>
    %227 = vector.shape_cast %226 : vector<16x384xf32> to vector<2x8x384xf32>
    %228 = vector.extract_strided_slice %227 {offsets = [0, 0, 0], sizes = [2, 8, 128], strides = [1, 1, 1]} : vector<2x8x384xf32> to vector<2x8x128xf32>
    %229 = vector.extract_strided_slice %227 {offsets = [0, 0, 128], sizes = [2, 8, 128], strides = [1, 1, 1]} : vector<2x8x384xf32> to vector<2x8x128xf32>
    %230 = vector.extract_strided_slice %227 {offsets = [0, 0, 256], sizes = [2, 8, 128], strides = [1, 1, 1]} : vector<2x8x384xf32> to vector<2x8x128xf32>
    "tpu.trace_start"() <{level = 10 : i32, message = "btg,bsg->bts"}> : () -> ()
    %cst_54 = arith.constant dense<0.000000e+00> : vector<2x8x8xf32>
    %231 = tpu.matmul %228, %229, %cst_54 {dimension_numbers = #tpu.dot_dimension_numbers<[2], [2], [1], [1], [0, 0, 0, 1, 1, 1], [0], [0]>} : vector<2x8x128xf32>, vector<2x8x128xf32>, vector<2x8x8xf32> -> vector<2x8x8xf32>
    "tpu.trace_stop"() : () -> ()
    %cst_55 = arith.constant dense<0xFF800000> : vector<2x8xf32>
    %232 = vector.multi_reduction <maximumf>, %231, %cst_55 [2] : vector<2x8x8xf32> to vector<2x8xf32>
    %cst_56 = arith.constant 0xFF800000 : f32
    %233 = vector.broadcast %cst_56 : f32 to vector<2x8xf32>
    %234 = arith.maximumf %233, %232 : vector<2x8xf32>
    %235 = vector.shape_cast %234 : vector<2x8xf32> to vector<2x8x1xf32>
    %236 = vector.broadcast %235 : vector<2x8x1xf32> to vector<2x8x8xf32>
    %237 = arith.subf %231, %236 : vector<2x8x8xf32>
    %238 = math.exp %237 : vector<2x8x8xf32>
    %cst_57 = arith.constant dense<0.000000e+00> : vector<2x8xf32>
    %239 = vector.multi_reduction <add>, %238, %cst_57 [2] : vector<2x8x8xf32> to vector<2x8xf32>
    %240 = vector.shape_cast %239 : vector<2x8xf32> to vector<2x8x1xf32>
    %241 = vector.broadcast %240 : vector<2x8x1xf32> to vector<2x8x8xf32>
    %242 = arith.divf %238, %241 : vector<2x8x8xf32>
    "tpu.trace_start"() <{level = 10 : i32, message = "bts,bsg->btg"}> : () -> ()
    %cst_58 = arith.constant dense<0.000000e+00> : vector<2x8x128xf32>
    %243 = tpu.matmul %242, %230, %cst_58 {dimension_numbers = #tpu.dot_dimension_numbers<[2], [1], [1], [2], [0, 0, 0, 1, 1, 2], [0], [0]>} : vector<2x8x8xf32>, vector<2x8x128xf32>, vector<2x8x128xf32> -> vector<2x8x128xf32>
    "tpu.trace_stop"() : () -> ()
    %cst_59 = arith.constant dense<0.000000e+00> : vector<2x128xf32>
    %244 = vector.multi_reduction <add>, %243, %cst_59 [1] : vector<2x8x128xf32> to vector<2x128xf32>
    %c0_60 = arith.constant 0 : index
    %c0_61 = arith.constant 0 : index
    %245 = vector.load %arg9[%c0_60, %c0_61] : memref<128x16xf32, #tpu.memory_space<vmem>>, vector<128x16xf32>
    %cst_62 = arith.constant dense<0.000000e+00> : vector<2x16xf32>
    %246 = tpu.matmul %244, %245, %cst_62 {dimension_numbers = #tpu.dot_dimension_numbers<[1], [0], [0], [1], [0, 0, 1, 1], [], []>} : vector<2x128xf32>, vector<128x16xf32>, vector<2x16xf32> -> vector<2x16xf32>
    %c0_63 = arith.constant 0 : index
    %c0_64 = arith.constant 0 : index
    %247 = vector.load %arg2[%c0_63, %c0_64] : memref<2x3xf32, #tpu.memory_space<vmem>>, vector<2x3xf32>
    %c0_65 = arith.constant 0 : index
    %c0_66 = arith.constant 0 : index
    %248 = vector.load %arg10[%c0_65, %c0_66] : memref<3x16xf32, #tpu.memory_space<vmem>>, vector<3x16xf32>
    %cst_67 = arith.constant dense<0.000000e+00> : vector<2x16xf32>
    %249 = tpu.matmul %247, %248, %cst_67 {dimension_numbers = #tpu.dot_dimension_numbers<[1], [0], [0], [1], [0, 0, 1, 1], [], []>} : vector<2x3xf32>, vector<3x16xf32>, vector<2x16xf32> -> vector<2x16xf32>
    %250 = arith.addf %246, %249 : vector<2x16xf32>
    %c0_68 = arith.constant 0 : index
    %c0_69 = arith.constant 0 : index
    %251 = vector.load %arg11[%c0_68, %c0_69] : memref<1x16xf32, #tpu.memory_space<vmem>>, vector<1x16xf32>
    %252 = vector.broadcast %251 : vector<1x16xf32> to vector<2x16xf32>
    %253 = arith.addf %250, %252 : vector<2x16xf32>
    %254 = math.tanh %253 : vector<2x16xf32>
    %c0_70 = arith.constant 0 : index
    %c0_71 = arith.constant 0 : index
    %255 = vector.load %arg12[%c0_70, %c0_71] : memref<2x16xf32, #tpu.memory_space<vmem>>, vector<2x16xf32>
    tpu.vector_store %arg12[%c0_70, %c0_71], %254 {strides = array<i32>} : memref<2x16xf32, #tpu.memory_space<vmem>>, vector<2x16xf32>,
    return
  }
  func.func @transform_0(%arg0: i32) -> (i32, i32) {
    %c0_i32 = arith.constant 0 : i32
    %c0_i32_0 = arith.constant 0 : i32
    return %arg0, %c0_i32 : i32, i32
  }
  func.func @transform_1(%arg0: i32) -> (i32, i32) {
    %c0_i32 = arith.constant 0 : i32
    %c0_i32_0 = arith.constant 0 : i32
    return %arg0, %c0_i32 : i32, i32
  }
  func.func @transform_2(%arg0: i32) -> (i32, i32) {
    %c0_i32 = arith.constant 0 : i32
    %c0_i32_0 = arith.constant 0 : i32
    %c0_i32_1 = arith.constant 0 : i32
    return %c0_i32, %c0_i32_0 : i32, i32
  }
  func.func @transform_3(%arg0: i32) -> (i32, i32) {
    %c0_i32 = arith.constant 0 : i32
    %c0_i32_0 = arith.constant 0 : i32
    %c0_i32_1 = arith.constant 0 : i32
    return %c0_i32, %c0_i32_0 : i32, i32
  }
  func.func @transform_4(%arg0: i32) -> (i32, i32) {
    %c0_i32 = arith.constant 0 : i32
    %c0_i32_0 = arith.constant 0 : i32
    %c0_i32_1 = arith.constant 0 : i32
    return %c0_i32, %c0_i32_0 : i32, i32
  }
  func.func @transform_5(%arg0: i32) -> (i32, i32) {
    %c0_i32 = arith.constant 0 : i32
    %c0_i32_0 = arith.constant 0 : i32
    %c0_i32_1 = arith.constant 0 : i32
    return %c0_i32, %c0_i32_0 : i32, i32
  }
  func.func @transform_6(%arg0: i32) -> (i32, i32) {
    %c0_i32 = arith.constant 0 : i32
    %c0_i32_0 = arith.constant 0 : i32
    %c0_i32_1 = arith.constant 0 : i32
    return %c0_i32, %c0_i32_0 : i32, i32
  }
  func.func @transform_7(%arg0: i32) -> (i32, i32) {
    %c0_i32 = arith.constant 0 : i32
    %c0_i32_0 = arith.constant 0 : i32
    %c0_i32_1 = arith.constant 0 : i32
    return %c0_i32, %c0_i32_0 : i32, i32
  }
  func.func @transform_8(%arg0: i32) -> (i32, i32) {
    %c0_i32 = arith.constant 0 : i32
    %c0_i32_0 = arith.constant 0 : i32
    %c0_i32_1 = arith.constant 0 : i32
    return %c0_i32, %c0_i32_0 : i32, i32
  }
  func.func @transform_9(%arg0: i32) -> (i32, i32) {
    %c0_i32 = arith.constant 0 : i32
    %c0_i32_0 = arith.constant 0 : i32
    %c0_i32_1 = arith.constant 0 : i32
    return %c0_i32, %c0_i32_0 : i32, i32
  }
  func.func @transform_10(%arg0: i32) -> (i32, i32) {
    %c0_i32 = arith.constant 0 : i32
    %c0_i32_0 = arith.constant 0 : i32
    %c0_i32_1 = arith.constant 0 : i32
    return %c0_i32, %c0_i32_0 : i32, i32
  }
  func.func @transform_11(%arg0: i32) -> (i32, i32) {
    %c0_i32 = arith.constant 0 : i32
    %c0_i32_0 = arith.constant 0 : i32
    return %arg0, %c0_i32 : i32, i32
  }
}

</mosaic_0001>

<bundles_post_ra>
// kernel: embed_atten_seq_pallas.1
= control target key start
LH: loop header
LB: loop body
LE: loop exit
PB: predicated region body
PF: predicated region fallthrough
CT: control target
= control target key end

     0   :  { %16 = vsyncpa [#allocation3], 0  ;;  %s3243_s0 = inlined_call_operand.vmem [shape: f32[16,5], index: 0, kind: input, shape index: {}]   ;;  %s3244_s1 = inlined_call_operand.vmem [shape: f32[2,3], index: 1, kind: input, shape index: {}]   ;;  %s3245_s2 = inlined_call_operand.vmem [shape: f32[5,256], index: 2, kind: input, shape index: {}]   ;;  %s3246_s3 = inlined_call_operand.hbm [shape: f32[128,256], index: 3, kind: input, shape index: {}]   ;;  %s3247_s4 = inlined_call_operand.vmem [shape: f32[1,256], index: 4, kind: input, shape index: {}]   ;;  %s3248_s5 = inlined_call_operand.vmem [shape: f32[1,256], index: 5, kind: input, shape index: {}]   ;;  %s3249_s6 = inlined_call_operand.hbm [shape: f32[128,384], index: 6, kind: input, shape index: {}]   ;;  %s3250_s7 = inlined_call_operand.vmem [shape: f32[1,384], index: 7, kind: input, shape index: {}]   ;;  %s3251_s8 = inlined_call_operand.vmem [shape: f32[128,16], index: 8, kind: input, shape index: {}]   ;;  %s3252_s9 = inlined_call_operand.vmem [shape: f32[3,16], index: 9, kind: input, shape index: {}]   ;;  %s3253_s10 = inlined_call_operand.vmem [shape: f32[1,16], index: 10, kind: input, shape index: {}]   ;;  %s3254_s11 = inlined_call_operand.hbm [shape: f32[2,16], index: 11, kind: output, shape index: {}]  }
   0x1   :  { %17 = vsyncpa [#allocation6], 0 }
   0x2   :  { %18 = vsyncpa [#allocation4], 0  ;;  %s2658_s17 = smov [#allocation2]   ;;  %s2586_s21 = scalar_lea.hbm %s3246_s3, 4096 }
   0x3   :  { %s30_s18 = sshll.u32 %s2658_s17, 4  ;;  %p2587_p0 = scmp.ne.s32.totalorder %s3246_s3, %s2586_s21  ;;  %s31_s18 = int_to_ptr.vmem [resolvable:$true] %s30_s18 }
   0x4   :  { %p2590_p1 = scmp.lt.u32.totalorder %s2586_s21, %s3246_s3 }
   0x6   :  { %p2592_p2 = pnand %p2590_p1, %p2587_p0 }
   0x8   :  { %2595 = shalt.err (!%p2592_p2)
}
   0x9   :  { %s2596_s26 = scalar_lea.vmem %s31_s18, 4096  ;;  %p2601_p4 = scmp.lt.s32.totalorder %s31_s18, %s31_s18 }
   0xa   :  { %p2597_p3 = scmp.ne.s32.totalorder %s31_s18, %s2596_s26  ;;  %p2602_p5 = scmp.lt.s32.totalorder %s2596_s26, %s2596_s26 }
   0xc   :  { %p2603_p6 = por %p2602_p5, %p2601_p4 }
   0xe   :  { %p2604_p7 = pnand %p2603_p6, %p2597_p3 }
  0x10   :  { %2607 = shalt.err (!%p2604_p7)
}
  0x11   :  { %s2659_s27 = smov 256   ;;  %s2660_s28 = smov 16  }
  0x12   :  { %36 = dma.hbm_to_vmem [thread:$0]  %s3246_s3, 4096, %s31_s18, [#allocation3], %s2659_s27, %s2659_s27, %s2660_s28  }
  0x13   :  { %s2661_s12 = smov [#allocation5]   ;;  %s2608_s16 = scalar_lea.hbm %s3249_s6, 6144 }
  0x14   :  { %s46_s13 = sshll.u32 %s2661_s12, 4  ;;  %p2609_p8 = scmp.ne.s32.totalorder %s3249_s6, %s2608_s16  ;;  %s47_s13 = int_to_ptr.vmem [resolvable:$true] %s46_s13 }
  0x15   :  { %p2612_p9 = scmp.lt.u32.totalorder %s2608_s16, %s3249_s6 }
  0x17   :  { %p2614_p10 = pnand %p2612_p9, %p2609_p8 }
  0x19   :  { %2617 = shalt.err (!%p2614_p10)
}
  0x1a   :  { %s2618_s22 = scalar_lea.vmem %s47_s13, 6144  ;;  %p2623_p12 = scmp.lt.s32.totalorder %s47_s13, %s47_s13 }
  0x1b   :  { %p2619_p11 = scmp.ne.s32.totalorder %s47_s13, %s2618_s22  ;;  %p2624_p13 = scmp.lt.s32.totalorder %s2618_s22, %s2618_s22 }
  0x1d   :  { %p2625_p0 = por %p2624_p13, %p2623_p12 }
  0x1f   :  { %p2626_p1 = pnand %p2625_p0, %p2619_p11 }
  0x21   :  { %2629 = shalt.err (!%p2626_p1)
}
  0x22   :  { %s2662_s3 = smov 384   ;;  %s2663_s18 = smov 24  }
  0x23   :  { %52 = dma.hbm_to_vmem [thread:$0]  %s3249_s6, 6144, %s47_s13, [#allocation6], %s2662_s3, %s2662_s3, %s2663_s18  }
  0x24   :  { %2652 = dma.done.wait [#allocation3], 4096  }
  0x25   :  { %2653 = vsyncadd [#allocation3], 4294963200 }
  0x26   :  { %2654 = dma.done.wait [#allocation6], 6144  }
  0x27   :  { %2655 = vsyncadd [#allocation6], 4294961152  ;;  %v2664_v0 = vmov 0.0   ;;  %v175_v1 = vld [vmem:[#allocation2 + $0x8] sm:$0xff]  ;;  %v177_v2 = vld [vmem:[#allocation2 + $0x18] sm:$0xff]  ;;  %vm90_vm0 = vcmask 1044480   ;;  %v73_v54 = vlaneseq }
  0x28   :  { %161 = vmatprep.mubr.f32.mxu0 %v2664_v0  ;;  %285 = vmatprep.mubr.f32.mxu1 %v2664_v0  ;;  %v174_v3 = vld [vmem:[#allocation2] sm:$0xff]  ;;  %v2756_v4 = vpack.c.bf16 %v177_v2, %v175_v1  ;;  %v176_v5 = vld [vmem:[#allocation2 + $0x10] sm:$0xff]  ;;  %v179_v6 = vld [vmem:[#allocation2 + $0x28] sm:$0xff]  ;;  %vm83_vm1 = vcmask 39936   ;;  %s2665_s14 = smov 64   ;;  %vm1253_vm3 = vcmask 1040384  }
  0x29   :  { %v181_v7 = vld [vmem:[#allocation2 + $0x38] sm:$0xff]  ;;  %v2758_v8 = vpack.c.bf16 %v176_v5, %v174_v3  ;;  %v178_v10 = vld [vmem:[#allocation2 + $0x20] sm:$0xff]  ;;  %v180_v11 = vld [vmem:[#allocation2 + $0x30] sm:$0xff]  ;;  %v2853_v55 = vshrl.u32 %v73_v54, 7  ;;  %vm1256_vm4 = vcmask 1041408   ;;  %vm1259_vm5 = vcmask 1042432  }
  0x2a   :  { %v2760_v9 = vpack.c.bf16 %v181_v7, %v179_v6  ;;  %v183_v12 = vld [vmem:[#allocation2 + $0x48] sm:$0xff]  ;;  %2173 = vmatprep.subr.bf16.mxu1 %v2756_v4  ;;  %v185_v13 = vld [vmem:[#allocation2 + $0x58] sm:$0xff]  ;;  %v2764_v14 = vpack.c.bf16 %v180_v11, %v178_v10  ;;  %v182_v16 = vld [vmem:[#allocation2 + $0x40] sm:$0xff]  ;;  %vm1262_vm6 = vcmask 1043456   ;;  %vm1267_vm7 = vcmask 1045504  }
  0x2b   :  { %2175 = vmatpush1.bf16.msra.mxu1 %v2758_v8  ;;  %v2767_v15 = vpack.c.bf16 %v185_v13, %v183_v12  ;;  %v184_v17 = vld [vmem:[#allocation2 + $0x50] sm:$0xff]  ;;  %v187_v18 = vld [vmem:[#allocation2 + $0x68] sm:$0xff]  ;;  %v189_v19 = vld [vmem:[#allocation2 + $0x78] sm:$0xff]  ;;  %v2856_v56 = vsub.s32 0, %v2853_v55  ;;  %v2881_v10 = vsub.s32 1, %v2853_v55  ;;  %vm1270_vm8 = vcmask 1046528  }
  0x2c   :  { %2177 = vmatprep.subr.bf16.mxu1 %v2760_v9  ;;  %v2770_v20 = vpack.c.bf16 %v184_v17, %v182_v16  ;;  %v2773_v21 = vpack.c.bf16 %v189_v19, %v187_v18  ;;  %v186_v22 = vld [vmem:[#allocation2 + $0x60] sm:$0xff]  ;;  %v188_v23 = vld [vmem:[#allocation2 + $0x70] sm:$0xff]  ;;  %v191_v24 = vld [vmem:[#allocation2 + $0x88] sm:$0xff]  ;;  %vm2667_vm9 = vmmov 0   ;;  %vm1630_vm10 = vcmask 64512  }
  0x2d   :  { %v193_v25 = vld [vmem:[#allocation2 + $0x98] sm:$0xff]  ;;  %v70_v26 = vld [vmem:[%s3245_s2 + $0x8] sm:$0x1f]  ;;  %v69_v27 = vld [vmem:[%s3245_s2] sm:$0x1f]  ;;  %v2786_v29 = vpack.c.bf16 %v188_v23, %v186_v22  ;;  %v2895_v23 = vand.u32 127, %v73_v54 }
  0x2e   :  { %2008 = vmatprep.subr.msk.mxu0 %vm90_vm0, %v70_v26  ;;  %v67_v28 = vld [vmem:[%s3243_s0] sm:$0xff]  ;;  %v2790_v30 = vpack.c.bf16 %v193_v25, %v191_v24  ;;  %v192_v32 = vld [vmem:[#allocation2 + $0x90] sm:$0xff]  ;;  %v195_v33 = vld [vmem:[#allocation2 + $0xa8] sm:$0xff]  ;;  %vm1829_vm11 = vcmask 23552   ;;  %vm1908_vm12 = vcmask 1041409   ;;  %vm1990_vm13 = vcmask 123904  }
  0x2f   :  { %2179 = vmatpush1.bf16.msra.mxu1 %v2764_v14  ;;  %2009 = vmatpush1.msk.msra.mxu0 %vm90_vm0, %v69_v27  ;;  %v190_v31 = vld [vmem:[#allocation2 + $0x80] sm:$0xff]  ;;  %v197_v34 = vld [vmem:[#allocation2 + $0xb8] sm:$0xff]  ;;  %v196_v38 = vld [vmem:[#allocation2 + $0xb0] sm:$0xff]  ;;  %vm209_vm2 = vcmp.lt.s32.totalorder %v2895_v23, 32 }
  0x30   :  { %2181 = vmatprep.subr.bf16.mxu1 %v2767_v15  ;;  %2010 = vmatmul.mubr.msk.f32.vlgmr.msra.gmra.mrb[0].mxu0 %vm83_vm1, %v67_v28  ;;  %v2797_v35 = vpack.c.bf16 %v192_v32, %v190_v31  ;;  %v2801_v36 = vpack.c.bf16 %v197_v34, %v195_v33  ;;  %v194_v37 = vld [vmem:[#allocation2 + $0xa0] sm:$0xff]  ;;  %v199_v39 = vld [vmem:[#allocation2 + $0xc8] sm:$0xff]  ;;  %v201_v40 = vld [vmem:[#allocation2 + $0xd8] sm:$0xff] }
  0x31   :  { %2205 = vmatprep.subr.bf16.mxu0 %v2756_v4  ;;  %167 = vmatprep.mubr.f32.mxu0 %v2664_v0  ;;  %v2805_v41 = vpack.c.bf16 %v196_v38, %v194_v37  ;;  %v2809_v42 = vpack.c.bf16 %v201_v40, %v199_v39  ;;  %v198_v43 = vld [vmem:[#allocation2 + $0xc0] sm:$0xff]  ;;  %v200_v44 = vld [vmem:[#allocation2 + $0xd0] sm:$0xff]  ;;  %v203_v45 = vld [vmem:[#allocation2 + $0xe8] sm:$0xff] }
  0x32   :  { %2207 = vmatpush1.bf16.msra.mxu0 %v2758_v8  ;;  %v205_v46 = vld [vmem:[#allocation2 + $0xf8] sm:$0xff]  ;;  %v2813_v47 = vpack.c.bf16 %v200_v44, %v198_v43  ;;  %v202_v49 = vld [vmem:[#allocation2 + $0xe0] sm:$0xff]  ;;  %v204_v50 = vld [vmem:[#allocation2 + $0xf0] sm:$0xff] }
  0x33   :  { %2183 = vmatpush1.bf16.msra.mxu1 %v2770_v20  ;;  %2209 = vmatprep.subr.bf16.mxu0 %v2760_v9  ;;  %v2817_v48 = vpack.c.bf16 %v205_v46, %v203_v45  ;;  %v2821_v51 = vpack.c.bf16 %v204_v50, %v202_v49  ;;  %v71_v57 = vld [vmem:[%s3247_s4] sm:$0x3]  ;;  %v68_v7 = vld [vmem:[%s3243_s0 + $0x8] sm:$0xff] }
  0x34   :  { %2185 = vmatprep.subr.bf16.mxu1 %v2773_v21  ;;  %v206_v58 = vld [vmem:[%s3248_s5] sm:$0x3]  ;;  %v2865_v59 = vrot.slane %v71_v57, %v2856_v56  ;;  %2011 = vmatmul.mubr.msk.f32.gmra.mrb[2].mxu0 %vm83_vm1, %v68_v7  ;;  %v2889_v17 = vrot.slane %v71_v57, %v2881_v10 }
  0x35   :  { %v2868_v60 = vrot.slane %v206_v58, %v2856_v56  ;;  %373 = vmatprep.mubr.f32.mxu0 %v2664_v0  ;;  %v2884_v11 = vrot.slane %v206_v58, %v2881_v10 }
  0x36   :  { %2211 = vmatpush1.bf16.msra.mxu0 %v2764_v14 }
  0x37   :  { %2187 = vmatpush1.bf16.msra.mxu1 %v2786_v29  ;;  %2213 = vmatprep.subr.bf16.mxu0 %v2767_v15 }
  0x38   :  { %2189 = vmatprep.subr.bf16.mxu1 %v2790_v30 }
  0x3a   :  { %2215 = vmatpush1.bf16.msra.mxu0 %v2770_v20 }
  0x3b   :  { %2191 = vmatpush1.bf16.msra.mxu1 %v2797_v35  ;;  %2217 = vmatprep.subr.bf16.mxu0 %v2773_v21 }
  0x3c   :  { %2193 = vmatprep.subr.bf16.mxu1 %v2801_v36 }
  0x3e   :  { %2219 = vmatpush1.bf16.msra.mxu0 %v2786_v29 }
  0x3f   :  { %2195 = vmatpush1.bf16.msra.mxu1 %v2805_v41  ;;  %2221 = vmatprep.subr.bf16.mxu0 %v2790_v30 }
  0x40   :  { %2197 = vmatprep.subr.bf16.mxu1 %v2809_v42 }
  0x42   :  { %2223 = vmatpush1.bf16.msra.mxu0 %v2797_v35 }
  0x43   :  { %2199 = vmatpush1.bf16.msra.mxu1 %v2813_v47  ;;  %2225 = vmatprep.subr.bf16.mxu0 %v2801_v36 }
  0x44   :  { %2201 = vmatprep.subr.bf16.mxu1 %v2817_v48 }
  0x46   :  { %2227 = vmatpush1.bf16.msra.mxu0 %v2805_v41 }
  0x47   :  { %2203 = vmatpush1.bf16.msra.mxu1 %v2821_v51  ;;  %2229 = vmatprep.subr.bf16.mxu0 %v2809_v42 }
  0x48   :  { %2237 = vmatprep.subr.bf16.mxu1 %v2756_v4 }
  0x4a   :  { %286 = vmatmul.mubr.f32.vlgmr.msra.gmra.mrb[0].mxu1 %v2664_v0  ;;  %2231 = vmatpush1.bf16.msra.mxu0 %v2813_v47 }
  0x4b   :  { %2239 = vmatpush1.bf16.msra.mxu1 %v2758_v8  ;;  %473 = vmatprep.mubr.f32.mxu1 %v2664_v0 }
  0x4c   :  { %2241 = vmatprep.subr.bf16.mxu1 %v2760_v9  ;;  %2233 = vmatprep.subr.bf16.mxu0 %v2817_v48 }
  0x4e   :  { %2235 = vmatpush1.bf16.msra.mxu0 %v2821_v51 }
  0x4f   :  { %2243 = vmatpush1.bf16.msra.mxu1 %v2764_v14  ;;  %2269 = vmatprep.subr.bf16.mxu0 %v2756_v4 }
  0x50   :  { %2245 = vmatprep.subr.bf16.mxu1 %v2767_v15 }
  0x53   :  { %2247 = vmatpush1.bf16.msra.mxu1 %v2770_v20 }
  0x54   :  { %2249 = vmatprep.subr.bf16.mxu1 %v2773_v21 }
  0x57   :  { %2251 = vmatpush1.bf16.msra.mxu1 %v2786_v29 }
  0x58   :  { %2253 = vmatprep.subr.bf16.mxu1 %v2790_v30 }
  0x5b   :  { %2255 = vmatpush1.bf16.msra.mxu1 %v2797_v35 }
  0x5c   :  { %2257 = vmatprep.subr.bf16.mxu1 %v2801_v36 }
  0x5f   :  { %2259 = vmatpush1.bf16.msra.mxu1 %v2805_v41 }
  0x60   :  { %2261 = vmatprep.subr.bf16.mxu1 %v2809_v42 }
  0x63   :  { %2263 = vmatpush1.bf16.msra.mxu1 %v2813_v47 }
  0x64   :  { %2265 = vmatprep.subr.bf16.mxu1 %v2817_v48 }
  0x67   :  { %2267 = vmatpush1.bf16.msra.mxu1 %v2821_v51 }
  0x68   :  { %2301 = vmatprep.subr.bf16.mxu1 %v2756_v4 }
 0x103   :  { %v163_v52 = vpop.f32.mrb[0].mxu0 }
 0x104   :  { %v165_v53 = vpop.f32.mrb[1].mxu0  ;;  %v2871_v61 = vadd.f32 %v163_v52, %v2865_v59 }
 0x105   :  { %v2892_v18 = vadd.f32 %v165_v53, %v2889_v17 }
 0x107   :  { %v2917_v31 = vpop.f32.mrb[2].mxu0 }
 0x108   :  { %v2919_v32 = vpop.f32.mrb[3].mxu0 }
 0x11d   :  { %v287_v62 = vpop.f32.mrb[0].mxu1 }
 0x11e   :  { %v288_v63 = vadd.f32 %v287_v62, %v2868_v60  ;;  %v289_v1 = vpop.f32.mrb[1].mxu1 }
 0x11f   :  { %v290_v12 = vadd.f32 %v289_v1, %v2884_v11 }
 0x120   :  { %v292_v2 = vadd.f32 %v288_v63, %v2871_v61 }
 0x122   :  { %v2012_v3 = vmul.f32 -1.442695, %v292_v2 }
 0x124   :  { %2528 = vpow2.f32 %v2012_v3 }
 0x12e   :  { %v2529_v5 = vpop.eup %2528 }
 0x12f   :  { %v296_v6 = vadd.f32 1.0, %v2529_v5 }
 0x131   :  { %2530 = vrcp.f32 %v296_v6 }
 0x13b   :  { %v2531_v13 = vpop.eup %2530 }
 0x13c   :  { %v299_v16 = vmul.f32 %v2531_v13, %v290_v12  ;;  %302 = vrot.lane.b32.xlu0 %v2531_v13, %s2665_s14 }
 0x13e   :  { %v300_v19 = vadd.f32 %v299_v16, %v2892_v18 }
 0x140   :  { %2532 = vtanh.f32 %v300_v19 }
 0x14a   :  { %v2533_v25 = vpop.eup %2532 }
 0x1ae   :  { %v303_v22 = vpop.permute.xlu0 %302 }
 0x1af   :  { %v304_v24 = vsub.f32 1.0, %v303_v22  ;;  %v306_v27 = vmul.f32 0.0, %v303_v22 }
 0x1b1   :  { %v305_v26 = vmul.f32 %v2533_v25, %v304_v24 }
 0x1b3   :  { %v307_v28 = vadd.f32 %v306_v27, %v305_v26 }
 0x1b5   :  { %2013 = vmatmul.mubr.msk.f32.vlgmr.msra.gmra.mrb[4].mxu0 %vm209_vm2, %v307_v28  ;;  %v2928_v63 = vsel %vm209_vm2, %v307_v28, 0.0 }
 0x1b6   :  { %2271 = vmatpush1.bf16.msra.mxu0 %v2758_v8  ;;  %573 = vmatprep.mubr.f32.mxu0 %v2664_v0 }
 0x1b7   :  { %2273 = vmatprep.subr.bf16.mxu0 %v2760_v9 }
 0x1ba   :  { %2275 = vmatpush1.bf16.msra.mxu0 %v2764_v14 }
 0x1bb   :  { %2277 = vmatprep.subr.bf16.mxu0 %v2767_v15 }
 0x1be   :  { %2279 = vmatpush1.bf16.msra.mxu0 %v2770_v20 }
 0x1bf   :  { %2281 = vmatprep.subr.bf16.mxu0 %v2773_v21 }
 0x1c2   :  { %2283 = vmatpush1.bf16.msra.mxu0 %v2786_v29 }
 0x1c3   :  { %2285 = vmatprep.subr.bf16.mxu0 %v2790_v30 }
 0x1c6   :  { %2287 = vmatpush1.bf16.msra.mxu0 %v2797_v35 }
 0x1c7   :  { %2289 = vmatprep.subr.bf16.mxu0 %v2801_v36 }
 0x1ca   :  { %2291 = vmatpush1.bf16.msra.mxu0 %v2805_v41 }
 0x1cb   :  { %2293 = vmatprep.subr.bf16.mxu0 %v2809_v42 }
 0x1ce   :  { %2295 = vmatpush1.bf16.msra.mxu0 %v2813_v47 }
 0x1cf   :  { %2297 = vmatprep.subr.bf16.mxu0 %v2817_v48 }
 0x1d2   :  { %2299 = vmatpush1.bf16.msra.mxu0 %v2821_v51 }
 0x1d3   :  { %2333 = vmatprep.subr.bf16.mxu0 %v2756_v4 }
 0x288   :  { %v375_v33 = vpop.f32.mrb[4].mxu0 }
 0x289   :  { %v376_v34 = vadd.f32 %v375_v33, %v2868_v60  ;;  %v377_v37 = vpop.f32.mrb[5].mxu0 }
 0x28a   :  { %v378_v45 = vadd.f32 %v377_v37, %v2884_v11 }
 0x28b   :  { %v381_v38 = vrot.slane %v376_v34, 6 }
 0x28c   :  { %v391_v46 = vrot.slane %v378_v45, 6 }
 0x28d   :  { %v383_v39 = vadd.f32 %v381_v38, %v2871_v61 }
 0x28f   :  { %v2014_v40 = vmul.f32 -1.442695, %v383_v39 }
 0x291   :  { %2534 = vpow2.f32 %v2014_v40 }
 0x29b   :  { %v2535_v43 = vpop.eup %2534 }
 0x29c   :  { %v387_v44 = vadd.f32 1.0, %v2535_v43 }
 0x29e   :  { %2536 = vrcp.f32 %v387_v44 }
 0x2a8   :  { %v2537_v49 = vpop.eup %2536 }
 0x2a9   :  { %v393_v50 = vmul.f32 %v2537_v49, %v391_v46  ;;  %v397_v52 = vrot.slane %v2537_v49, 2 }
 0x2ab   :  { %399 = vrot.lane.b32.xlu0 %v397_v52, %s2665_s14  ;;  %v394_v53 = vadd.f32 %v393_v50, %v2892_v18 }
 0x2ad   :  { %2538 = vtanh.f32 %v394_v53 }
 0x2b7   :  { %v2539_v54 = vpop.eup %2538 }
 0x2b8   :  { %v403_v62 = vrot.slane %v2539_v54, 2 }
 0x31d   :  { %v400_v57 = vpop.permute.xlu0 %399 }
 0x31e   :  { %v401_v58 = vsub.f32 1.0, %v400_v57  ;;  %v406_v2 = vmul.f32 %v400_v57, %v2928_v63 }
 0x320   :  { %v405_v1 = vmul.f32 %v403_v62, %v401_v58 }
 0x322   :  { %v407_v3 = vadd.f32 %v406_v2, %v405_v1 }
 0x324   :  { %2015 = vmatmul.mubr.msk.f32.vlgmr.msra.gmra.mrb[2].mxu1 %vm209_vm2, %v407_v3  ;;  %v2957_v40 = vsel %vm209_vm2, %v407_v3, 0.0 }
 0x325   :  { %2303 = vmatpush1.bf16.msra.mxu1 %v2758_v8  ;;  %673 = vmatprep.mubr.f32.mxu1 %v2664_v0 }
 0x326   :  { %2305 = vmatprep.subr.bf16.mxu1 %v2760_v9 }
 0x329   :  { %2307 = vmatpush1.bf16.msra.mxu1 %v2764_v14 }
 0x32a   :  { %2309 = vmatprep.subr.bf16.mxu1 %v2767_v15 }
 0x32d   :  { %2311 = vmatpush1.bf16.msra.mxu1 %v2770_v20 }
 0x32e   :  { %2313 = vmatprep.subr.bf16.mxu1 %v2773_v21 }
 0x331   :  { %2315 = vmatpush1.bf16.msra.mxu1 %v2786_v29 }
 0x332   :  { %2317 = vmatprep.subr.bf16.mxu1 %v2790_v30 }
 0x335   :  { %2319 = vmatpush1.bf16.msra.mxu1 %v2797_v35 }
 0x336   :  { %2321 = vmatprep.subr.bf16.mxu1 %v2801_v36 }
 0x339   :  { %2323 = vmatpush1.bf16.msra.mxu1 %v2805_v41 }
 0x33a   :  { %2325 = vmatprep.subr.bf16.mxu1 %v2809_v42 }
 0x33d   :  { %2327 = vmatpush1.bf16.msra.mxu1 %v2813_v47 }
 0x33e   :  { %2329 = vmatprep.subr.bf16.mxu1 %v2817_v48 }
 0x341   :  { %2331 = vmatpush1.bf16.msra.mxu1 %v2821_v51 }
 0x342   :  { %2365 = vmatprep.subr.bf16.mxu1 %v2756_v4 }
 0x3f7   :  { %v475_v5 = vpop.f32.mrb[2].mxu1 }
 0x3f8   :  { %v476_v6 = vadd.f32 %v475_v5, %v2868_v60  ;;  %v477_v7 = vpop.f32.mrb[3].mxu1 }
 0x3f9   :  { %v478_v24 = vadd.f32 %v477_v7, %v2884_v11 }
 0x3fa   :  { %v481_v12 = vrot.slane %v476_v6, 4 }
 0x3fb   :  { %v491_v25 = vrot.slane %v478_v24, 4  ;;  %v3009_v24 = vadd.f32 %v2917_v31, %v2865_v59  ;;  %v3017_v59 = vadd.f32 %v2919_v32, %v2889_v17 }
 0x3fc   :  { %v483_v13 = vadd.f32 %v481_v12, %v2871_v61 }
 0x3fe   :  { %v2016_v16 = vmul.f32 -1.442695, %v483_v13 }
 0x400   :  { %2540 = vpow2.f32 %v2016_v16 }
 0x40a   :  { %v2541_v19 = vpop.eup %2540 }
 0x40b   :  { %v487_v22 = vadd.f32 1.0, %v2541_v19 }
 0x40d   :  { %2542 = vrcp.f32 %v487_v22 }
 0x417   :  { %v2543_v26 = vpop.eup %2542 }
 0x418   :  { %v493_v27 = vmul.f32 %v2543_v26, %v491_v25  ;;  %v497_v28 = vrot.slane %v2543_v26, 4 }
 0x41a   :  { %499 = vrot.lane.b32.xlu1 %v497_v28, %s2665_s14  ;;  %v494_v33 = vadd.f32 %v493_v27, %v2892_v18 }
 0x41c   :  { %2544 = vtanh.f32 %v494_v33 }
 0x426   :  { %v2545_v34 = vpop.eup %2544 }
 0x427   :  { %v503_v39 = vrot.slane %v2545_v34, 4 }
 0x48c   :  { %v500_v37 = vpop.permute.xlu1 %499 }
 0x48d   :  { %v501_v38 = vsub.f32 1.0, %v500_v37  ;;  %v506_v44 = vmul.f32 %v500_v37, %v2957_v40 }
 0x48f   :  { %v505_v43 = vmul.f32 %v503_v39, %v501_v38 }
 0x491   :  { %v507_v45 = vadd.f32 %v506_v44, %v505_v43 }
 0x493   :  { %2017 = vmatmul.mubr.msk.f32.vlgmr.msra.gmra.mrb[6].mxu0 %vm209_vm2, %v507_v45  ;;  %v2986_v13 = vsel %vm209_vm2, %v507_v45, 0.0 }
 0x494   :  { %2335 = vmatpush1.bf16.msra.mxu0 %v2758_v8  ;;  %761 = vmatprep.mubr.f32.mxu0 %v2664_v0 }
 0x495   :  { %2337 = vmatprep.subr.bf16.mxu0 %v2760_v9 }
 0x498   :  { %2339 = vmatpush1.bf16.msra.mxu0 %v2764_v14 }
 0x499   :  { %2341 = vmatprep.subr.bf16.mxu0 %v2767_v15 }
 0x49c   :  { %2343 = vmatpush1.bf16.msra.mxu0 %v2770_v20 }
 0x49d   :  { %2345 = vmatprep.subr.bf16.mxu0 %v2773_v21 }
 0x4a0   :  { %2347 = vmatpush1.bf16.msra.mxu0 %v2786_v29 }
 0x4a1   :  { %2349 = vmatprep.subr.bf16.mxu0 %v2790_v30 }
 0x4a4   :  { %2351 = vmatpush1.bf16.msra.mxu0 %v2797_v35 }
 0x4a5   :  { %2353 = vmatprep.subr.bf16.mxu0 %v2801_v36 }
 0x4a8   :  { %2355 = vmatpush1.bf16.msra.mxu0 %v2805_v41 }
 0x4a9   :  { %2357 = vmatprep.subr.bf16.mxu0 %v2809_v42 }
 0x4ac   :  { %2359 = vmatpush1.bf16.msra.mxu0 %v2813_v47 }
 0x4ad   :  { %2361 = vmatprep.subr.bf16.mxu0 %v2817_v48 }
 0x4b0   :  { %2363 = vmatpush1.bf16.msra.mxu0 %v2821_v51 }
 0x4b1   :  { %2397 = vmatprep.subr.bf16.mxu0 %v2756_v4 }
 0x566   :  { %v575_v46 = vpop.f32.mrb[6].mxu0 }
 0x567   :  { %v576_v49 = vadd.f32 %v575_v46, %v2868_v60  ;;  %v577_v50 = vpop.f32.mrb[7].mxu0 }
 0x568   :  { %v578_v62 = vadd.f32 %v577_v50, %v2884_v11 }
 0x569   :  { %v581_v52 = vrot.slane %v576_v49, 2 }
 0x56a   :  { %v591_v1 = vrot.slane %v578_v62, 2 }
 0x56b   :  { %v583_v53 = vadd.f32 %v581_v52, %v2871_v61 }
 0x56d   :  { %v2018_v54 = vmul.f32 -1.442695, %v583_v53 }
 0x56f   :  { %2546 = vpow2.f32 %v2018_v54 }
 0x579   :  { %v2547_v57 = vpop.eup %2546 }
 0x57a   :  { %v587_v58 = vadd.f32 1.0, %v2547_v57 }
 0x57c   :  { %2548 = vrcp.f32 %v587_v58 }
 0x586   :  { %v2549_v2 = vpop.eup %2548 }
 0x587   :  { %v593_v3 = vmul.f32 %v2549_v2, %v591_v1  ;;  %v597_v5 = vrot.slane %v2549_v2, 6 }
 0x589   :  { %599 = vrot.lane.b32.xlu1 %v597_v5, %s2665_s14  ;;  %v594_v4 = vadd.f32 %v593_v3, %v2892_v18 }
 0x58b   :  { %2550 = vtanh.f32 %v594_v4 }
 0x595   :  { %v2551_v6 = vpop.eup %2550 }
 0x596   :  { %v603_v61 = vrot.slane %v2551_v6, 6 }
 0x5fb   :  { %v600_v7 = vpop.permute.xlu1 %599 }
 0x5fc   :  { %v601_v12 = vsub.f32 1.0, %v600_v7  ;;  %v606_v19 = vmul.f32 %v600_v7, %v2986_v13 }
 0x5fe   :  { %v605_v16 = vmul.f32 %v603_v61, %v601_v12 }
 0x600   :  { %v607_v22 = vadd.f32 %v606_v19, %v605_v16 }
 0x602   :  { %2019 = vmatmul.mubr.msk.f32.vlgmr.msra.gmra.mrb[4].mxu1 %vm209_vm2, %v607_v22  ;;  %v3022_v46 = vsel %vm209_vm2, %v607_v22, 0.0 }
 0x603   :  { %2367 = vmatpush1.bf16.msra.mxu1 %v2758_v8  ;;  %861 = vmatprep.mubr.f32.mxu1 %v2664_v0 }
 0x604   :  { %2369 = vmatprep.subr.bf16.mxu1 %v2760_v9 }
 0x607   :  { %2371 = vmatpush1.bf16.msra.mxu1 %v2764_v14 }
 0x608   :  { %2373 = vmatprep.subr.bf16.mxu1 %v2767_v15 }
 0x60b   :  { %2375 = vmatpush1.bf16.msra.mxu1 %v2770_v20 }
 0x60c   :  { %2377 = vmatprep.subr.bf16.mxu1 %v2773_v21 }
 0x60f   :  { %2379 = vmatpush1.bf16.msra.mxu1 %v2786_v29 }
 0x610   :  { %2381 = vmatprep.subr.bf16.mxu1 %v2790_v30 }
 0x613   :  { %2383 = vmatpush1.bf16.msra.mxu1 %v2797_v35 }
 0x614   :  { %2385 = vmatprep.subr.bf16.mxu1 %v2801_v36 }
 0x617   :  { %2387 = vmatpush1.bf16.msra.mxu1 %v2805_v41 }
 0x618   :  { %2389 = vmatprep.subr.bf16.mxu1 %v2809_v42 }
 0x61b   :  { %2391 = vmatpush1.bf16.msra.mxu1 %v2813_v47 }
 0x61c   :  { %2393 = vmatprep.subr.bf16.mxu1 %v2817_v48 }
 0x61f   :  { %2395 = vmatpush1.bf16.msra.mxu1 %v2821_v51 }
 0x6d5   :  { %v675_v18 = vpop.f32.mrb[4].mxu1 }
 0x6d6   :  { %v676_v25 = vadd.f32 %v675_v18, %v2868_v60  ;;  %v677_v26 = vpop.f32.mrb[5].mxu1 }
 0x6d7   :  { %v678_v37 = vadd.f32 %v677_v26, %v2884_v11 }
 0x6d8   :  { %v680_v27 = vadd.f32 %v676_v25, %v3009_v24 }
 0x6da   :  { %v2020_v28 = vmul.f32 -1.442695, %v680_v27 }
 0x6dc   :  { %2552 = vpow2.f32 %v2020_v28 }
 0x6e6   :  { %v2553_v33 = vpop.eup %2552 }
 0x6e7   :  { %v684_v34 = vadd.f32 1.0, %v2553_v33 }
 0x6e9   :  { %2554 = vrcp.f32 %v684_v34 }
 0x6f3   :  { %v2555_v38 = vpop.eup %2554 }
 0x6f4   :  { %v687_v39 = vmul.f32 %v2555_v38, %v678_v37  ;;  %690 = vrot.lane.b32.xlu0 %v2555_v38, %s2665_s14 }
 0x6f6   :  { %v688_v31 = vadd.f32 %v687_v39, %v3017_v59 }
 0x6f8   :  { %2556 = vtanh.f32 %v688_v31  ;;  %v1274_v31 = vld [vmem:[#allocation5 + $0x8] sm:$0xff] }
 0x702   :  { %v2557_v45 = vpop.eup %2556 }
 0x766   :  { %v691_v43 = vpop.permute.xlu0 %690 }
 0x767   :  { %v692_v44 = vsub.f32 1.0, %v691_v43  ;;  %v694_v50 = vmul.f32 %v691_v43, %v3022_v46  ;;  %v1277_v43 = vld [vmem:[#allocation5 + $0x20] sm:$0xff] }
 0x769   :  { %v693_v49 = vmul.f32 %v2557_v45, %v692_v44  ;;  %v1273_v44 = vld [vmem:[#allocation5] sm:$0xff]  ;;  %v2428_v45 = vpack.c.bf16 %v1277_v43, %v1274_v31  ;;  %v1299_v43 = vld [vmem:[#allocation5 + $0xd0] sm:$0xff] }
 0x76b   :  { %v695_v52 = vadd.f32 %v694_v50, %v693_v49  ;;  %v1276_v49 = vld [vmem:[#allocation5 + $0x18] sm:$0xff]  ;;  %v1275_v50 = vld [vmem:[#allocation5 + $0x10] sm:$0xff]  ;;  %2429 = vmatprep.subr.bf16.mxu1 %v2428_v45 }
 0x76d   :  { %2021 = vmatmul.mubr.msk.f32.vlgmr.msra.gmra.mrb[8].mxu0 %vm209_vm2, %v695_v52  ;;  %v3050_v54 = vsel %vm209_vm2, %v695_v52, 0.0  ;;  %v1278_v52 = vld [vmem:[#allocation5 + $0x28] sm:$0xff] }
 0x76e   :  { %2399 = vmatpush1.bf16.msra.mxu0 %v2758_v8  ;;  %961 = vmatprep.mubr.f32.mxu0 %v2664_v0 }
 0x76f   :  { %2401 = vmatprep.subr.bf16.mxu0 %v2760_v9 }
 0x772   :  { %2403 = vmatpush1.bf16.msra.mxu0 %v2764_v14 }
 0x773   :  { %2405 = vmatprep.subr.bf16.mxu0 %v2767_v15 }
 0x776   :  { %2407 = vmatpush1.bf16.msra.mxu0 %v2770_v20 }
 0x777   :  { %2409 = vmatprep.subr.bf16.mxu0 %v2773_v21 }
 0x77a   :  { %2411 = vmatpush1.bf16.msra.mxu0 %v2786_v29 }
 0x77b   :  { %2413 = vmatprep.subr.bf16.mxu0 %v2790_v30 }
 0x77e   :  { %2415 = vmatpush1.bf16.msra.mxu0 %v2797_v35 }
 0x77f   :  { %2417 = vmatprep.subr.bf16.mxu0 %v2801_v36 }
 0x782   :  { %2419 = vmatpush1.bf16.msra.mxu0 %v2805_v41 }
 0x783   :  { %2421 = vmatprep.subr.bf16.mxu0 %v2809_v42 }
 0x786   :  { %2423 = vmatpush1.bf16.msra.mxu0 %v2813_v47 }
 0x787   :  { %2425 = vmatprep.subr.bf16.mxu0 %v2817_v48 }
 0x78a   :  { %2427 = vmatpush1.bf16.msra.mxu0 %v2821_v51 }
 0x840   :  { %v763_v8 = vpop.f32.mrb[8].mxu0 }
 0x841   :  { %v764_v9 = vadd.f32 %v763_v8, %v2868_v60  ;;  %v765_v14 = vpop.f32.mrb[9].mxu0  ;;  %v2430_v8 = vpack.c.bf16 %v1276_v49, %v1273_v44  ;;  %v1302_v44 = vld [vmem:[#allocation5 + $0xe8] sm:$0xff] }
 0x842   :  { %v766_v35 = vadd.f32 %v765_v14, %v2884_v11  ;;  %v1280_v14 = vld [vmem:[#allocation5 + $0x38] sm:$0xff]  ;;  %v2476_v49 = vpack.c.bf16 %v1302_v44, %v1299_v43 }
 0x843   :  { %v769_v15 = vrot.slane %v764_v9, 6  ;;  %v2460_v9 = vpack.c.bf16 %v1278_v52, %v1275_v50  ;;  %v1304_v50 = vld [vmem:[#allocation5 + $0xf8] sm:$0xff]  ;;  %v1307_v52 = vld [vmem:[#allocation5 + $0x110] sm:$0xff] }
 0x844   :  { %v779_v36 = vrot.slane %v766_v35, 6  ;;  %v1284_v35 = vld [vmem:[#allocation5 + $0x58] sm:$0xff] }
 0x845   :  { %v771_v20 = vadd.f32 %v769_v15, %v3009_v24  ;;  %v1283_v15 = vld [vmem:[#allocation5 + $0x50] sm:$0xff]  ;;  %2461 = vmatprep.subr.bf16.mxu0 %v2460_v9 }
 0x847   :  { %v2022_v21 = vmul.f32 -1.442695, %v771_v20  ;;  %v1279_v20 = vld [vmem:[#allocation5 + $0x30] sm:$0xff] }
 0x849   :  { %2558 = vpow2.f32 %v2022_v21  ;;  %v2432_v21 = vpack.c.bf16 %v1283_v15, %v1280_v14  ;;  %v1306_v14 = vld [vmem:[#allocation5 + $0x108] sm:$0xff]  ;;  %v1305_v15 = vld [vmem:[#allocation5 + $0x100] sm:$0xff] }
 0x853   :  { %v2559_v29 = vpop.eup %2558 }
 0x854   :  { %v775_v30 = vadd.f32 1.0, %v2559_v29  ;;  %v1282_v29 = vld [vmem:[#allocation5 + $0x48] sm:$0xff] }
 0x856   :  { %2560 = vrcp.f32 %v775_v30  ;;  %v1281_v30 = vld [vmem:[#allocation5 + $0x40] sm:$0xff] }
 0x860   :  { %v2561_v41 = vpop.eup %2560 }
 0x861   :  { %v781_v42 = vmul.f32 %v2561_v41, %v779_v36  ;;  %v785_v47 = vrot.slane %v2561_v41, 2  ;;  %v2434_v36 = vpack.c.bf16 %v1282_v29, %v1279_v20  ;;  %v2464_v41 = vpack.c.bf16 %v1284_v35, %v1281_v30  ;;  %v1308_v20 = vld [vmem:[#allocation5 + $0x118] sm:$0xff]  ;;  %v1313_v29 = vld [vmem:[#allocation5 + $0x140] sm:$0xff] }
 0x862   :  { %v1309_v35 = vld [vmem:[#allocation5 + $0x120] sm:$0xff] }
 0x863   :  { %787 = vrot.lane.b32.xlu1 %v785_v47, %s2665_s14  ;;  %v782_v48 = vadd.f32 %v781_v42, %v3017_v59  ;;  %v1286_v42 = vld [vmem:[#allocation5 + $0x68] sm:$0xff]  ;;  %v1289_v47 = vld [vmem:[#allocation5 + $0x80] sm:$0xff] }
 0x865   :  { %2562 = vtanh.f32 %v782_v48  ;;  %v1285_v48 = vld [vmem:[#allocation5 + $0x60] sm:$0xff] }
 0x86f   :  { %v2563_v51 = vpop.eup %2562 }
 0x870   :  { %v791_v53 = vrot.slane %v2563_v51, 2  ;;  %v2436_v51 = vpack.c.bf16 %v1289_v47, %v1286_v42  ;;  %v1311_v47 = vld [vmem:[#allocation5 + $0x130] sm:$0xff] }
 0x8d5   :  { %v788_v17 = vpop.permute.xlu1 %787 }
 0x8d6   :  { %v789_v32 = vsub.f32 1.0, %v788_v17  ;;  %v794_v58 = vmul.f32 %v788_v17, %v3050_v54  ;;  %v1288_v17 = vld [vmem:[#allocation5 + $0x78] sm:$0xff] }
 0x8d8   :  { %v793_v57 = vmul.f32 %v791_v53, %v789_v32  ;;  %v1287_v32 = vld [vmem:[#allocation5 + $0x70] sm:$0xff]  ;;  %v1290_v53 = vld [vmem:[#allocation5 + $0x88] sm:$0xff] }
 0x8da   :  { %v795_v62 = vadd.f32 %v794_v58, %v793_v57  ;;  %v2468_v57 = vpack.c.bf16 %v1290_v53, %v1287_v32  ;;  %v1292_v58 = vld [vmem:[#allocation5 + $0x98] sm:$0xff]  ;;  %v1319_v32 = vld [vmem:[#allocation5 + $0x170] sm:$0xff] }
 0x8dc   :  { %2023 = vmatmul.mubr.msk.f32.vlgmr.msra.gmra.mrb[6].mxu1 %vm209_vm2, %v795_v62  ;;  %v3063_v34 = vsel %vm209_vm2, %v795_v62, 0.0  ;;  %v1295_v62 = vld [vmem:[#allocation5 + $0xb0] sm:$0xff] }
 0x8dd   :  { %1402 = vmatprep.mubr.f32.mxu1 %v2664_v0  ;;  %2431 = vmatpush1.bf16.msra.mxu1 %v2430_v8  ;;  %v2448_v8 = vpack.c.bf16 %v1307_v52, %v1304_v50 }
 0x8de   :  { %2433 = vmatprep.subr.bf16.mxu1 %v2432_v21  ;;  %v1310_v21 = vld [vmem:[#allocation5 + $0x128] sm:$0xff] }
 0x8df   :  { %v2452_v30 = vpack.c.bf16 %v1313_v29, %v1310_v21 }
 0x8e1   :  { %2435 = vmatpush1.bf16.msra.mxu1 %v2434_v36  ;;  %v1312_v36 = vld [vmem:[#allocation5 + $0x138] sm:$0xff] }
 0x8e2   :  { %2437 = vmatprep.subr.bf16.mxu1 %v2436_v51  ;;  %v2454_v42 = vpack.c.bf16 %v1312_v36, %v1309_v35 }
 0x9af   :  { %v863_v1 = vpop.f32.mrb[6].mxu1 }
 0x9b0   :  { %v864_v2 = vadd.f32 %v863_v1, %v2868_v60  ;;  %v865_v3 = vpop.f32.mrb[7].mxu1  ;;  %v1293_v1 = vld [vmem:[#allocation5 + $0xa0] sm:$0xff] }
 0x9b1   :  { %v866_v61 = vadd.f32 %v865_v3, %v2884_v11  ;;  %v2438_v3 = vpack.c.bf16 %v1288_v17, %v1285_v48  ;;  %v1314_v48 = vld [vmem:[#allocation5 + $0x148] sm:$0xff]  ;;  %v1316_v17 = vld [vmem:[#allocation5 + $0x158] sm:$0xff] }
 0x9b2   :  { %v869_v5 = vrot.slane %v864_v2, 4  ;;  %v1296_v2 = vld [vmem:[#allocation5 + $0xb8] sm:$0xff]  ;;  %v2484_v51 = vpack.c.bf16 %v1314_v48, %v1311_v47  ;;  %v2456_v53 = vpack.c.bf16 %v1319_v32, %v1316_v17 }
 0x9b3   :  { %v879_v16 = vrot.slane %v866_v61, 4  ;;  %v1301_v61 = vld [vmem:[#allocation5 + $0xe0] sm:$0xff]  ;;  %2439 = vmatpush1.bf16.msra.mxu1 %v2438_v3  ;;  %v1320_v3 = vld [vmem:[#allocation5 + $0x178] sm:$0xff] }
 0x9b4   :  { %v871_v4 = vadd.f32 %v869_v5, %v3009_v24  ;;  %v2440_v5 = vpack.c.bf16 %v1295_v62, %v1292_v58  ;;  %v1318_v58 = vld [vmem:[#allocation5 + $0x168] sm:$0xff] }
 0x9b6   :  { %v2024_v6 = vmul.f32 -1.442695, %v871_v4  ;;  %v1291_v4 = vld [vmem:[#allocation5 + $0x90] sm:$0xff]  ;;  %2441 = vmatprep.subr.bf16.mxu1 %v2440_v5 }
 0x9b8   :  { %2564 = vpow2.f32 %v2024_v6  ;;  %v1294_v6 = vld [vmem:[#allocation5 + $0xa8] sm:$0xff] }
 0x9c2   :  { %v2565_v7 = vpop.eup %2564 }
 0x9c3   :  { %v875_v12 = vadd.f32 1.0, %v2565_v7  ;;  %v2472_v7 = vpack.c.bf16 %v1296_v2, %v1293_v1  ;;  %v1317_v2 = vld [vmem:[#allocation5 + $0x160] sm:$0xff] }
 0x9c5   :  { %2566 = vrcp.f32 %v875_v12  ;;  %v1298_v12 = vld [vmem:[#allocation5 + $0xc8] sm:$0xff] }
 0x9cf   :  { %v2567_v19 = vpop.eup %2566 }
 0x9d0   :  { %v881_v22 = vmul.f32 %v2567_v19, %v879_v16  ;;  %v885_v18 = vrot.slane %v2567_v19, 4  ;;  %v2442_v16 = vpack.c.bf16 %v1294_v6, %v1291_v4  ;;  %v2444_v19 = vpack.c.bf16 %v1301_v61, %v1298_v12 }
 0x9d2   :  { %887 = vrot.lane.b32.xlu0 %v885_v18, %s2665_s14  ;;  %v882_v25 = vadd.f32 %v881_v22, %v3017_v59  ;;  %v1297_v22 = vld [vmem:[#allocation5 + $0xc0] sm:$0xff]  ;;  %v1300_v18 = vld [vmem:[#allocation5 + $0xd8] sm:$0xff]  ;;  %2443 = vmatpush1.bf16.msra.mxu1 %v2442_v16 }
 0x9d3   :  { %2445 = vmatprep.subr.bf16.mxu1 %v2444_v19 }
 0x9d4   :  { %2568 = vtanh.f32 %v882_v25  ;;  %v2446_v25 = vpack.c.bf16 %v1300_v18, %v1297_v22 }
 0x9d6   :  { %2447 = vmatpush1.bf16.msra.mxu1 %v2446_v25 }
 0x9d7   :  { %2449 = vmatprep.subr.bf16.mxu1 %v2448_v8 }
 0x9de   :  { %v2569_v26 = vpop.eup %2568 }
 0x9df   :  { %v891_v33 = vrot.slane %v2569_v26, 4 }
 0xa44   :  { %v888_v27 = vpop.permute.xlu0 %887 }
 0xa45   :  { %v889_v28 = vsub.f32 1.0, %v888_v27  ;;  %v894_v38 = vmul.f32 %v888_v27, %v3063_v34 }
 0xa47   :  { %v893_v37 = vmul.f32 %v891_v33, %v889_v28 }
 0xa49   :  { %v3066_v39 = vadd.f32 %v894_v38, %v893_v37 }
 0xa4b   :  { %2025 = vmatmul.mubr.msk.f32.vlgmr.msra.gmra.mrb[10].mxu0 %vm209_vm2, %v3066_v39 }
 0xa4c   :  { %2463 = vmatpush3.bf16.msra.mxu0 %v2460_v9  ;;  %v1303_v9 = vld [vmem:[#allocation5 + $0xf0] sm:$0xff] }
 0xa4d   :  { %2465 = vmatprep.subr.bf16.mxu0 %v2464_v41 }
 0xa50   :  { %2467 = vmatpush3.bf16.msra.mxu0 %v2464_v41 }
 0xa51   :  { %2469 = vmatprep.subr.bf16.mxu0 %v2468_v57 }
 0xa54   :  { %2471 = vmatpush3.bf16.msra.mxu0 %v2468_v57  ;;  %v1315_v57 = vld [vmem:[#allocation5 + $0x150] sm:$0xff] }
 0xa55   :  { %2473 = vmatprep.subr.bf16.mxu0 %v2472_v7  ;;  %v2458_v1 = vpack.c.bf16 %v1318_v58, %v1315_v57 }
 0xa58   :  { %2475 = vmatpush3.bf16.msra.mxu0 %v2472_v7  ;;  %v2666_v7 = vmov 1966171168  }
 0xa59   :  { %2477 = vmatprep.subr.bf16.mxu0 %v2476_v49  ;;  %v999_v12 = vunpack.c.l.s4 %v2666_v7 }
 0xa5b   :  { %v1000_v61 = vunpack.c.0.s8 %v999_v12 }
 0xa5c   :  { %2479 = vmatpush3.bf16.msra.mxu0 %v2476_v49 }
 0xa5d   :  { %v3078_v19 = vsub.s32 %v1000_v61, %v2853_v55 }
 0xa5f   :  { %v1004_v22 = vrot.slane %v2928_v63, %v3078_v19  ;;  %v1029_v18 = vrot.slane %v2957_v40, %v3078_v19  ;;  %v1052_v25 = vrot.slane %v2986_v13, %v3078_v19  ;;  %v1121_v13 = vrot.slane %v3063_v34, %v3078_v19 }
 0xa61   :  { %v1037_v63 = vrot.slane %v1029_v18, %v3078_v19  ;;  %v1060_v40 = vrot.slane %v1052_v25, %v3078_v19 }
 0xa63   :  { %v1186_v8 = vrot.slane %v1037_v63, %v2856_v56 }
 0xb1e   :  { %v963_v26 = vpop.f32.mrb[10].mxu0 }
 0xb1f   :  { %v964_v27 = vadd.f32 %v963_v26, %v2868_v60  ;;  %v965_v28 = vpop.f32.mrb[11].mxu0  ;;  %v2450_v60 = vpack.c.bf16 %v1306_v14, %v1303_v9  ;;  %v1005_v26 = vcombine.high %v1004_v22, %v1004_v22  ;;  %v1196_v9 = vrot.slane %v1060_v40, %v2856_v56 }
 0xb20   :  { %v966_v41 = vadd.f32 %v965_v28, %v2884_v11  ;;  %v2488_v11 = vpack.c.bf16 %v1320_v3, %v1317_v2  ;;  %v1075_v28 = vrot.slane %v3022_v46, %v3078_v19  ;;  %v1122_v14 = vcombine.high %v1121_v13, %v1121_v13 }
 0xb21   :  { %v969_v33 = vrot.slane %v964_v27, 2  ;;  %2451 = vmatpush1.bf16.msra.mxu1 %v2450_v60  ;;  %v1030_v27 = vcombine.high %v1029_v18, %v1029_v18  ;;  %v1019_v43 = vrot.slane %v1005_v26, %v3078_v19 }
 0xb22   :  { %2453 = vmatprep.subr.bf16.mxu1 %v2452_v30  ;;  %v979_v62 = vrot.slane %v966_v41, 2  ;;  %v1076_v44 = vcombine.high %v1075_v28, %v1075_v28  ;;  %v1129_v30 = vrot.slane %v1121_v13, %v3078_v19 }
 0xb23   :  { %v971_v37 = vadd.f32 %v969_v33, %v3009_v24  ;;  %v2480_v24 = vpack.c.bf16 %v1308_v20, %v1305_v15  ;;  %v1098_v33 = vrot.slane %v3050_v54, %v3078_v19 }
 0xb24   :  { %v1090_v29 = vrot.slane %v1076_v44, %v3078_v19 }
 0xb25   :  { %v2026_v38 = vmul.f32 -1.442695, %v971_v37  ;;  %2481 = vmatprep.subr.bf16.mxu0 %v2480_v24  ;;  %2455 = vmatpush1.bf16.msra.mxu1 %v2454_v42  ;;  %v1099_v49 = vcombine.high %v1098_v33, %v1098_v33  ;;  %v1106_v60 = vrot.slane %v1098_v33, %v3078_v19 }
 0xb26   :  { %2483 = vmatpush3.bf16.msra.mxu0 %v2480_v24  ;;  %2457 = vmatprep.subr.bf16.mxu1 %v2456_v53  ;;  %v1210_v58 = vrot.slane %v1090_v29, %v2856_v56 }
 0xb27   :  { %2570 = vpow2.f32 %v2026_v38  ;;  %2485 = vmatprep.subr.bf16.mxu0 %v2484_v51  ;;  %v1053_v38 = vcombine.high %v1052_v25, %v1052_v25  ;;  %v1113_v36 = vrot.slane %v1099_v49, %v3078_v19  ;;  %v1216_v32 = vrot.slane %v1106_v60, %v2856_v56 }
 0xb29   :  { %2459 = vmatpush1.bf16.msra.mxu1 %v2458_v1  ;;  %v1067_v34 = vrot.slane %v1053_v38, %v3078_v19  ;;  %v1333_v38 = vsub.s32 2, %v2853_v55 }
 0xb2a   :  { %2487 = vmatpush3.bf16.msra.mxu0 %v2484_v51  ;;  %v1136_v51 = vrot.slane %v1122_v14, %v3078_v19 }
 0xb2b   :  { %2489 = vmatprep.subr.bf16.mxu0 %v2488_v11  ;;  %v1200_v48 = vrot.slane %v1067_v34, %v2856_v56 }
 0xb2c   :  { %v1230_v23 = vrot.slane %v1136_v51, %v2856_v56  ;;  %v1812_v51 = vld [vmem:[%s3251_s8 + $0x8] sm:$0xff] }
 0xb2e   :  { %2491 = vmatpush3.bf16.msra.mxu0 %v2488_v11 }
 0xb2f   :  { %2112 = vmatprep.subr.mxu0 %v2664_v0 }
 0xb31   :  { %v2571_v31 = vpop.eup %2570 }
 0xb32   :  { %v975_v45 = vadd.f32 1.0, %v2571_v31  ;;  %v1012_v31 = vrot.slane %v1004_v22, %v3078_v19 }
 0xb34   :  { %2572 = vrcp.f32 %v975_v45  ;;  %v1083_v45 = vrot.slane %v1075_v28, %v3078_v19  ;;  %v1254_v47 = vsel %vm1253_vm3, %v1012_v31, %v1186_v8 }
 0xb35   :  { %v1257_v17 = vsel %vm1256_vm4, %v1254_v47, %v1196_v9 }
 0xb36   :  { %v1206_v35 = vrot.slane %v1083_v45, %v2856_v56 }
 0xb38   :  { %v1260_v3 = vsel %vm1259_vm5, %v1257_v17, %v1206_v35  ;;  %v1813_v17 = vld [vmem:[%s3251_s8 + $0x10] sm:$0xff] }
 0xb39   :  { %v1263_v61 = vsel %vm1262_vm6, %v1260_v3, %v1216_v32  ;;  %v2668_v32 = vmov 0.0|0.0   ;;  %v1817_v3 = vld [vmem:[%s3251_s8 + $0x30] sm:$0xff] }
 0xb3a   :  { %2492 = vmatprep.subr.bf16.mxu1 %v2668_v32 }
 0xb3e   :  { %v2573_v5 = vpop.eup %2572 }
 0xb3f   :  { %v981_v4 = vmul.f32 %v2573_v5, %v979_v62  ;;  %v985_v6 = vrot.slane %v2573_v5, 6  ;;  %v1226_v62 = vrot.slane %v1129_v30, %v2856_v56  ;;  %v1220_v5 = vrot.slane %v1113_v36, %v2856_v56 }
 0xb41   :  { %987 = vrot.lane.b32.xlu1 %v985_v6, %s2665_s14  ;;  %v982_v16 = vadd.f32 %v981_v4, %v3017_v59  ;;  %v896_v59 = vsel %vm209_vm2, %v3066_v39, 0.0  ;;  %v1044_v39 = vrot.slane %v1030_v27, %v3078_v19  ;;  %v1265_v22 = vsel %vm90_vm0, %v1263_v61, %v1226_v62  ;;  %v1815_v62 = vld [vmem:[%s3251_s8 + $0x20] sm:$0xff] }
 0xb42   :  { %v1144_v46 = vrot.slane %v896_v59, %v3078_v19 }
 0xb43   :  { %2574 = vtanh.f32 %v982_v16  ;;  %v1190_v21 = vrot.slane %v1044_v39, %v2856_v56 }
 0xb44   :  { %v1145_v24 = vcombine.high %v1144_v46, %v1144_v46  ;;  %v1152_v42 = vrot.slane %v1144_v46, %v3078_v19 }
 0xb45   :  { %v1255_v2 = vsel %vm1253_vm3, %v1019_v43, %v1190_v21 }
 0xb46   :  { %v1159_v57 = vrot.slane %v1145_v24, %v3078_v19  ;;  %v1236_v11 = vrot.slane %v1152_v42, %v2856_v56  ;;  %v1258_v7 = vsel %vm1256_vm4, %v1255_v2, %v1200_v48  ;;  %v1811_v48 = vld [vmem:[%s3251_s8] sm:$0xff] }
 0xb47   :  { %v1261_v25 = vsel %vm1259_vm5, %v1258_v7, %v1210_v58 }
 0xb48   :  { %v1240_v12 = vrot.slane %v1159_v57, %v2856_v56  ;;  %v1268_v26 = vsel %vm1267_vm7, %v1265_v22, %v1236_v11  ;;  %v1264_v27 = vsel %vm1262_vm6, %v1261_v25, %v1220_v5  ;;  %v1814_v57 = vld [vmem:[%s3251_s8 + $0x18] sm:$0xff]  ;;  %v1820_v22 = vld [vmem:[%s3251_s8 + $0x48] sm:$0xff]  ;;  %v1821_v25 = vld [vmem:[%s3251_s8 + $0x50] sm:$0xff] }
 0xb49   :  { %v1266_v33 = vsel %vm90_vm0, %v1264_v27, %v1230_v23  ;;  %v2496_v58 = vpack.c.bf16 %v1814_v57, %v1813_v17  ;;  %v1818_v5 = vld [vmem:[%s3251_s8 + $0x38] sm:$0xff]  ;;  %v1823_v27 = vld [vmem:[%s3251_s8 + $0x60] sm:$0xff] }
 0xb4a   :  { %v2502_v11 = vpack.c.bf16 %v1818_v5, %v1817_v3 }
 0xb4d   :  { %v2575_v37 = vpop.eup %2574 }
 0xb4e   :  { %v991_v52 = vrot.slane %v2575_v37, 6  ;;  %v1269_v37 = vsel %vm1267_vm7, %v1266_v33, %v1240_v12  ;;  %v1825_v33 = vld [vmem:[%s3251_s8 + $0x70] sm:$0xff] }
 0xbb3   :  { %v988_v54 = vpop.permute.xlu1 %987 }
 0xbb4   :  { %v989_v50 = vsub.f32 1.0, %v988_v54  ;;  %v994_v20 = vmul.f32 %v988_v54, %v896_v59 }
 0xbb6   :  { %v993_v15 = vmul.f32 %v991_v52, %v989_v50 }
 0xbb8   :  { %v995_v41 = vadd.f32 %v994_v20, %v993_v15 }
 0xbba   :  { %v996_v53 = vsel %vm209_vm2, %v995_v41, 0.0 }
 0xbbb   :  { %v1167_v1 = vrot.slane %v996_v53, %v3078_v19  ;;  %v2493_v53 = vpack.c.bf16 %v1812_v51, %v1811_v48 }
 0xbbd   :  { %v1168_v4 = vcombine.high %v1167_v1, %v1167_v1  ;;  %v1175_v6 = vrot.slane %v1167_v1, %v3078_v19  ;;  %v1816_v1 = vld [vmem:[%s3251_s8 + $0x28] sm:$0xff] }
 0xbbe   :  { %v2499_v2 = vpack.c.bf16 %v1816_v1, %v1815_v62 }
 0xbbf   :  { %v1246_v16 = vrot.slane %v1175_v6, %v2856_v56  ;;  %v1182_v18 = vrot.slane %v1168_v4, %v3078_v19  ;;  %v1321_v19 = vld [vmem:[%s3250_s7] sm:$0x7] }
 0xbc0   :  { %v1330_v40 = vrot.slane %v1321_v19, %v2881_v10  ;;  %v1334_v13 = vrot.slane %v1321_v19, %v1333_v38  ;;  %v1326_v46 = vrot.slane %v1321_v19, %v2856_v56  ;;  %v1828_v19 = vld [vmem:[%s3252_s9] sm:$0x7]  ;;  %s2669_s9 = smov [#allocation7]  }
 0xbc1   :  { %v1271_v28 = vsel %vm1270_vm8, %v1268_v26, %v1246_v16  ;;  %v1250_v59 = vrot.slane %v1182_v18, %v2856_v56  ;;  %v1819_v16 = vld [vmem:[%s3251_s8 + $0x40] sm:$0xff]  ;;  %v1822_v26 = vld [vmem:[%s3251_s8 + $0x58] sm:$0xff]  ;;  %s1998_s24 = sshll.u32 %s2669_s9, 4  ;;  %s1999_s24 = int_to_ptr.vmem [resolvable:$true] %s1998_s24 }
 0xbc2   :  { %1403 = vmatmul.mubr.f32.vlgmr.msra.gmra.mrb[8].mxu1 %v1271_v28  ;;  %2109 = vmatprep.mubr.f32.mxu0 %v1271_v28  ;;  %v2505_v18 = vpack.c.bf16 %v1820_v22, %v1819_v16  ;;  %v1824_v28 = vld [vmem:[%s3251_s8 + $0x68] sm:$0xff]  ;;  %v1827_v38 = vld [vmem:[%s3244_s1] sm:$0x3]  ;;  %s2630_s6 = scalar_lea.vmem %s1999_s24, 32  ;;  %p2635_p3 = scmp.lt.s32.totalorder %s1999_s24, %s1999_s24 }
 0xbc3   :  { %v1272_v63 = vsel %vm1270_vm8, %v1269_v37, %v1250_v59  ;;  %1408 = vmatprep.mubr.f32.mxu1 %v2664_v0  ;;  %2494 = vmatpush3.bf16.msra.mxu1 %v2493_v53  ;;  %v2511_v59 = vpack.c.bf16 %v1824_v28, %v1823_v27  ;;  %v1826_v37 = vld [vmem:[%s3251_s8 + $0x78] sm:$0xff]  ;;  %p2631_p2 = scmp.ne.s32.totalorder %s1999_s24, %s2630_s6  ;;  %p2636_p4 = scmp.lt.s32.totalorder %s2630_s6, %s2630_s6 }
 0xbc4   :  { %2110 = vmatmul.mubr.f32.vlgmr.msra.gmra.mrb[12].mxu0 %v1272_v63  ;;  %2495 = vmatprep.subr.bf16.mxu1 %v2668_v32 }
 0xbc5   :  { %2114 = vmatprep.mubr.msk.f32.mxu0 %vm2667_vm9, %v2664_v0  ;;  %p2637_p5 = por %p2636_p4, %p2635_p3 }
 0xbc6   :  { %1409 = vmatmul.mubr.f32.gmra.mrb[10].mxu1 %v1272_v63  ;;  %v2514_v63 = vpack.c.bf16 %v1826_v37, %v1825_v33 }
 0xbc7   :  { %2169 = vmatprep.mubr.msk.f32.mxu1 %vm2667_vm9, %v2664_v0  ;;  %2497 = vmatpush3.bf16.msra.mxu1 %v2496_v58  ;;  %p2638_p6 = pnand %p2637_p5, %p2631_p2 }
 0xbc8   :  { %2498 = vmatprep.subr.bf16.mxu1 %v2668_v32 }
 0xbcb   :  { %2500 = vmatpush3.bf16.msra.mxu1 %v2499_v2 }
 0xbcc   :  { %2501 = vmatprep.subr.bf16.mxu1 %v2668_v32 }
 0xbcf   :  { %2503 = vmatpush3.bf16.msra.mxu1 %v2502_v11 }
 0xbd0   :  { %2504 = vmatprep.subr.bf16.mxu1 %v2668_v32 }
 0xbd3   :  { %2506 = vmatpush3.bf16.msra.mxu1 %v2505_v18 }
 0xbd4   :  { %2507 = vmatprep.subr.bf16.mxu1 %v2668_v32 }
 0xc95   :  { %v1404_v31 = vpop.f32.mrb[8].mxu1 }
 0xc96   :  { %v1406_v43 = vpop.f32.mrb[9].mxu1  ;;  %v1405_v50 = vadd.f32 %v1404_v31, %v1326_v46 }
 0xc97   :  { %v1407_v39 = vadd.f32 %v1406_v43, %v1330_v40  ;;  %v2111_v44 = vpop.f32.mrb[12].mxu0 }
 0xc98   :  { %v3152_v54 = vadd.f32 %v2111_v44, %v1334_v13  ;;  %v1481_v45 = vpop.f32.mrb[13].mxu0 }
 0xc99   :  { %v1410_v49 = vpop.f32.mrb[10].mxu1  ;;  %2113 = vmatpush3.xpose.msra.mxu0 %v1407_v39  ;;  %v1482_v56 = vadd.f32 %v1481_v45, %v1334_v13 }
 0xc9a   :  { %v1412_v52 = vpop.f32.mrb[11].mxu1  ;;  %2117 = vmatprep.subr.mxu0 %v2664_v0  ;;  %v1411_v55 = vadd.f32 %v1410_v49, %v1326_v46 }
 0xc9b   :  { %v1413_v8 = vadd.f32 %v1412_v52, %v1330_v40 }
 0xc9c   :  { %2115 = vmatmul.mubr.f32.vlgmr.msra.gmra.mrb[14].mxu0 %v1405_v50 }
 0xc9d   :  { %2118 = vmatpush3.xpose.msra.mxu0 %v1413_v8  ;;  %2119 = vmatprep.mubr.msk.f32.mxu0 %vm2667_vm9, %v2664_v0 }
 0xc9e   :  { %2122 = vmatprep.subr.mxu0 %v2664_v0 }
 0xca0   :  { %2120 = vmatmul.mubr.f32.vlgmr.msra.gmra.mrb[16].mxu0 %v1411_v55 }
 0xca1   :  { %2123 = vmatpush3.msra.mxu0 %v1482_v56  ;;  %2124 = vmatprep.mubr.msk.f32.mxu0 %vm2667_vm9, %v2664_v0 }
 0xca2   :  { %2127 = vmatprep.subr.mxu0 %v2664_v0 }
 0xd6f   :  { %v1556_v10 = vpop.f32.mrb[14].mxu0 }
 0xd70   :  { %v2116_v34 = vpop.f32.mrb[15].mxu0  ;;  %v1631_v9 = vsel %vm1630_vm10, %v1556_v10, -inf }
 0xd71   :  { %1632 = vmax.xlane.f32.xlu0 %v1631_v9 }
 0xd73   :  { %v1626_v14 = vpop.f32.mrb[16].mxu0 }
 0xd74   :  { %v2121_v60 = vpop.f32.mrb[17].mxu0  ;;  %v1634_v15 = vsel %vm1630_vm10, %v1626_v14, -inf }
 0xd75   :  { %1635 = vmax.xlane.f32.xlu1 %v1634_v15  ;;  %v2031_v15 = vld [vmem:[%s3253_s10] ss:$0 sm:$0xff] }
 0xdfe   :  { %v1633_v20 = vpop.xlane.xlu0 %1632 }
 0xdff   :  { %v1637_v24 = vsub.f32 %v1556_v10, %v1633_v20 }
 0xe01   :  { %v1639_v21 = vmul.f32 1.442695, %v1637_v24 }
 0xe02   :  { %v1636_v29 = vpop.xlane.xlu1 %1635 }
 0xe03   :  { %2576 = vpow2.f32 %v1639_v21  ;;  %v1638_v30 = vsub.f32 %v1626_v14, %v1636_v29 }
 0xe05   :  { %v1641_v35 = vmul.f32 1.442695, %v1638_v30 }
 0xe07   :  { %2578 = vpow2.f32 %v1641_v35 }
 0xe0d   :  { %v2577_v36 = vpop.eup %2576 }
 0xe0e   :  { %v1643_v41 = vsel %vm1630_vm10, %v2577_v36, 0.0 }
 0xe0f   :  { %1644 = vadd.xlane.f32.xlu0 %v1643_v41 }
 0xe11   :  { %v2579_v42 = vpop.eup %2578 }
 0xe12   :  { %v1646_v47 = vsel %vm1630_vm10, %v2579_v42, 0.0 }
 0xe13   :  { %1647 = vadd.xlane.f32.xlu0 %v1646_v47 }
 0xe9c   :  { %v1645_v23 = vpop.xlane.xlu0 %1644 }
 0xe9d   :  { %2580 = vrcp.f32 %v1645_v23 }
 0xea0   :  { %v1648_v4 = vpop.xlane.xlu0 %1647 }
 0xea1   :  { %2582 = vrcp.f32 %v1648_v4 }
 0xea7   :  { %v2581_v6 = vpop.eup %2580 }
 0xea8   :  { %v1650_v7 = vmul.f32 %v2581_v6, %v2577_v36 }
 0xeaa   :  { %2125 = vmatmul.mubr.msk.f32.vlgmr.msra.gmra.mrb[18].mxu0 %vm1630_vm10, %v1650_v7 }
 0xeab   :  { %v2583_v12 = vpop.eup %2582  ;;  %2128 = vmatpush3.msra.mxu0 %v3152_v54  ;;  %2129 = vmatprep.mubr.msk.f32.mxu0 %vm2667_vm9, %v2664_v0 }
 0xeac   :  { %v1652_v61 = vmul.f32 %v2583_v12, %v2579_v42  ;;  %2132 = vmatprep.subr.mxu0 %v2664_v0 }
 0xeae   :  { %2130 = vmatmul.mubr.msk.f32.vlgmr.msra.gmra.mrb[20].mxu0 %vm1630_vm10, %v1652_v61 }
 0xeaf   :  { %2134 = vmatprep.mubr.msk.f32.mxu0 %vm2667_vm9, %v2664_v0  ;;  %v2508_v0 = vpack.c.bf16 %v1822_v26, %v1821_v25  ;;  %2133 = vmatpush3.msk.msra.mxu0 %vm1259_vm5, %v1828_v19 }
 0xeb1   :  { %2509 = vmatpush3.bf16.msra.mxu1 %v2508_v0 }
 0xeb2   :  { %2510 = vmatprep.subr.bf16.mxu1 %v2668_v32  ;;  %2135 = vmatmul.mubr.msk.f32.vlgmr.msra.gmra.mrb[22].mxu0 %vm1829_vm11, %v1827_v38 }
 0xeb5   :  { %2512 = vmatpush3.bf16.msra.mxu1 %v2511_v59 }
 0xeb6   :  { %2513 = vmatprep.subr.bf16.mxu1 %v2668_v32 }
 0xeb9   :  { %2515 = vmatpush3.bf16.msra.mxu1 %v2514_v63 }
 0xf7d   :  { %v1722_v40 = vpop.f32.mrb[18].mxu0 }
 0xf7e   :  { %v1799_v13 = vrot.slane %v1722_v40, 4  ;;  %v2126_v31 = vpop.f32.mrb[19].mxu0 }
 0xf80   :  { %v1800_v46 = vadd.f32 %v1799_v13, %v1722_v40 }
 0xf81   :  { %v1795_v43 = vpop.f32.mrb[20].mxu0 }
 0xf82   :  { %v1801_v39 = vrot.slane %v1800_v46, 2  ;;  %v1805_v44 = vrot.slane %v1795_v43, 4  ;;  %v2131_v54 = vpop.f32.mrb[21].mxu0 }
 0xf84   :  { %v1802_v45 = vadd.f32 %v1801_v39, %v1800_v46  ;;  %v1806_v49 = vadd.f32 %v1805_v44, %v1795_v43 }
 0xf85   :  { %v1902_v9 = vpop.f32.mrb[22].mxu0 }
 0xf86   :  { %v1807_v50 = vrot.slane %v1806_v49, 2  ;;  %v1803_v52 = vrot.slane %v1802_v45, 1  ;;  %v2136_v14 = vpop.f32.mrb[23].mxu0 }
 0xf88   :  { %v1808_v8 = vadd.f32 %v1807_v50, %v1806_v49  ;;  %v1804_v56 = vadd.f32 %v1803_v52, %v1802_v45 }
 0xf8a   :  { %v1809_v55 = vrot.slane %v1808_v8, 1 }
 0xf8c   :  { %v1810_v10 = vadd.f32 %v1809_v55, %v1808_v8 }
 0xf8e   :  { %v1909_v34 = vsel %vm1908_vm12, %v1810_v10, %v1804_v56 }
 0xf8f   :  { %2170 = vmatmul.mubr.f32.vlgmr.msra.gmra.mrb[12].mxu1 %v1909_v34 }
0x1062   :  { %v1977_v60 = vpop.f32.mrb[12].mxu1 }
0x1063   :  { %v1978_v20 = vadd.f32 %v1977_v60, %v1902_v9  ;;  %v2171_v24 = vpop.f32.mrb[13].mxu1 }
0x1065   :  { %v1988_v21 = vadd.f32 %v2031_v15, %v1978_v20 }
0x1067   :  { %2584 = vtanh.f32 %v1988_v21 }
0x1071   :  { %v2585_v29 = vpop.eup %2584 }
0x1072   :  { %1991 = vst.msk [vmem:[#allocation7] sm:$0x3] %vm1990_vm13, %v2585_v29 }
0x1073   :  { %2641 = shalt.err (!%p2638_p6)
}
0x1074   :  { %s2642_s10 = scalar_lea.hbm %s3254_s11, 32 }
0x1075   :  { %p2643_p7 = scmp.ne.s32.totalorder %s3254_s11, %s2642_s10  ;;  %p2646_p8 = scmp.lt.u32.totalorder %s2642_s10, %s3254_s11 }
0x1077   :  { %p2648_p9 = pnand %p2646_p8, %p2643_p7 }
0x1079   :  { %2651 = shalt.err (!%p2648_p9)
}
0x107a   :  { %2001 = dma.vmem_to_hbm [thread:$0]  %s1999_s24, 32, %s3254_s11, [#allocation4]  }
0x107b   :  { %2656 = dma.done.wait [#allocation4], 32  }
0x107c   :  { %2657 = vsyncadd [#allocation4], 4294967264 }
0x107d   :  { %2005 = vsyncpa [#allocation3], 1 }
0x107e   :  { %2006 = vsyncpa [#allocation6], 1 }
0x107f   :  { %2007 = vsyncpa [#allocation4], 1 }

</bundles_post_ra>
